<compile_context>
chip_gen: v5e
topology: v5e:2x2
jax: 0.10.0
libtpu: 0.0.40
codegen_flags: <defaults>
</compile_context>

<pallas_src>
import jax
import jax.numpy as jnp
import numpy as np
from jax.experimental import pallas as pl
from jax.experimental.pallas import tpu as pltpu


# ---------------------------------------------------------------------------
# Kernel
# ---------------------------------------------------------------------------
def _make_kernel(H, W, chunk, cdt):
    HW = H * W
    f32 = jnp.float32

    def conv3x3(z, w_ref, b_ref, mask_ref):
        # z: [Cin, HW] f32 (channel-major, lane-dense)
        # w_ref: [9, Cout, Cin] (cdt), b_ref: [Cout, 1] f32, mask_ref: [9, HW] f32
        cout = w_ref.shape[1]
        acc = jnp.zeros((cout, HW), f32)
        for ky in range(3):
            for kx in range(3):
                tap = ky * 3 + kx
                off = (ky - 1) * W + (kx - 1)          # tap reads pixel p + off
                zt = z if off == 0 else pltpu.roll(z, (-off) % HW, axis=1)
                contrib = jnp.dot(w_ref[tap], zt.astype(cdt),
                                  preferred_element_type=f32)      # [Cout, HW]
                if ky == 1 and kx == 1:                # center tap: mask all ones
                    acc = acc + contrib
                else:
                    acc = acc + mask_ref[tap].reshape(1, HW) * contrib
        return acc + b_ref[...]

    def kernel(x_ref, w1_ref, b1_ref, w2_ref, b2_ref, w3_ref,
               mask_ref, gwt_ref, mcat_ref, scal_ref, o_ref):
        # ---- conv stage (channel-major, recomputed per output strip) -------
        x = x_ref[0]                                                 # [Cin, HW]
        y1 = jnp.maximum(conv3x3(x, w1_ref, b1_ref, mask_ref), 0.0)  # [C1, HW]
        y2 = jnp.maximum(conv3x3(y1, w2_ref, b2_ref, mask_ref), 0.0) # [C2, HW]

        # ---- conv3: 1x1 -> 1 channel on the MXU (w3 zero-padded to 8 rows) -
        y3 = jnp.dot(w3_ref[...], y2.astype(cdt),
                     preferred_element_type=f32)[0:1]                # [1, HW]
        y3 = y3 + scal_ref[0]                                        # + b3 (SMEM)

        # ---- lane row -> [H, W]  (tiny relayout: 1 KB of data) -------------
        y3_2d = jnp.concatenate(
            [y3[:, i * W:(i + 1) * W] for i in range(H)], axis=0)    # [H, W]
        y3c = y3_2d.astype(cdt)

        # ---- fused ConvTranspose + bilinear tail ----------------------------
        #   U = vertcat_k(y3 @ GwT_k)  (sublane concat)  -> one K=4H matmul
        u = jnp.concatenate(
            [jnp.dot(y3c, gwt_ref[k], preferred_element_type=f32)
             for k in range(4)], axis=0).astype(cdt)                 # [4H, Wo]
        bt = scal_ref[1]
        strip_h = mcat_ref.shape[0]
        for c in range(0, strip_h, chunk):                           # row chunks
            blk = jnp.dot(mcat_ref[pl.ds(c, chunk), :], u,
                          preferred_element_type=f32) + bt           # [chunk, Wo]
            o_ref[0, pl.ds(c, chunk), :] = blk.astype(o_ref.dtype)

    return kernel


# ---------------------------------------------------------------------------
# Constant matrices for the ConvTranspose + bilinear tail (built in wrapper)
# ---------------------------------------------------------------------------
def _interp_matrix(out_size, in_size):
    """Bilinear interpolation matrix (align_corners=False), [out_size, in_size]."""
    scale = in_size / out_size
    src = (np.arange(out_size, dtype=np.float64) + 0.5) * scale - 0.5
    src = np.maximum(src, 0.0)
    i0 = np.minimum(np.floor(src).astype(np.int64), in_size - 1)
    i1 = np.minimum(i0 + 1, in_size - 1)
    w = src - i0
    a = np.zeros((out_size, in_size), np.float64)
    a[np.arange(out_size), i0] += 1.0 - w
    a[np.arange(out_size), i1] += w
    return a


def _scatter_matrix(in_size, k, stride=2, pad=1, ksize=4):
    """S_k with S_k[stride*p - pad + k, p] = 1 (ConvTranspose tap placement)."""
    out_size = (in_size - 1) * stride - 2 * pad + ksize
    s = np.zeros((out_size, in_size), np.float64)
    for p in range(in_size):
        i = stride * p - pad + k
        if 0 <= i < out_size:
            s[i, p] = 1.0
    return s


# ---------------------------------------------------------------------------
# Wrapper
# ---------------------------------------------------------------------------
def mask_head_forward(x, params, out_hw=(224, 224), *,
                      mxu_dtype=jnp.float32, n_strips=2, chunk=56):
    """MaskHeadSmallConv.forward.  x: [B, Cin, H, W] (NCHW) -> [B, 1, 224, 224]."""
    B, Cin, H, W = x.shape
    HW = H * W
    C1 = params["b1"].shape[0]
    C2 = params["b2"].shape[0]
    Ho, Wo = out_hw
    assert Ho % n_strips == 0
    strip = Ho // n_strips
    assert strip % chunk == 0 and chunk % 8 == 0
    f32 = jnp.float32
    cdt = mxu_dtype

    # ---- layout plumbing (wrapper side, cheap) ------------------------------
    x_cm = x.reshape(B, Cin, HW).astype(f32)             # NCHW is already channel-major
    w1 = jnp.transpose(params["w1"], (2, 3, 0, 1)).reshape(9, C1, Cin).astype(cdt)
    w2 = jnp.transpose(params["w2"], (2, 3, 0, 1)).reshape(9, C2, C1).astype(cdt)
    b1 = params["b1"].reshape(C1, 1).astype(f32)
    b2 = params["b2"].reshape(C2, 1).astype(f32)
    # conv3 weight, zero-padded to 8 MXU rows (row 0 is the real one).
    w3 = jnp.zeros((8, C2), cdt).at[0].set(params["w3"].reshape(C2).astype(cdt))
    scal = jnp.concatenate([params["b3"].reshape(1),
                            params["bt"].reshape(1)]).astype(f32)    # [b3, bt]

    # ---- 3x3 border masks (shared by conv1/conv2), [9, HW] ------------------
    ii, jj = np.meshgrid(np.arange(H), np.arange(W), indexing="ij")
    masks = np.zeros((9, HW), np.float32)
    for ky in range(3):
        for kx in range(3):
            ok = ((ii + ky - 1 >= 0) & (ii + ky - 1 < H) &
                  (jj + kx - 1 >= 0) & (jj + kx - 1 < W))
            masks[ky * 3 + kx] = ok.astype(np.float32).reshape(HW)
    masks = jnp.asarray(masks)

    # ---- fold ConvTranspose2d(1,1,4,2,1) + bilinear(Ho,Wo) into constants ----
    #   up  = sum_{ki,kj} wt[ki,kj] * S_ki @ y3 @ S_kj^T
    #   out = Ah @ up @ Aw^T
    #       = Mcat @ vertcat_kj( y3 @ (Aw @ S_kj)^T ),
    #     with Mcat = hcat_kj( sum_ki wt[ki,kj] * Ah @ S_ki )      ([Ho, 4H])
    ah = _interp_matrix(Ho, 2 * H)                                        # [Ho, 2H]
    aw = _interp_matrix(Wo, 2 * W)                                        # [Wo, 2W]
    gh = jnp.asarray(np.stack([ah @ _scatter_matrix(H, k) for k in range(4)]),
                     dtype=f32)                                           # [4, Ho, H]
    gw = np.stack([aw @ _scatter_matrix(W, k) for k in range(4)])         # [4, Wo, W]
    gwt = jnp.asarray(np.transpose(gw, (0, 2, 1)), dtype=cdt)             # [4, W, Wo]
    wt = params["wt"].reshape(4, 4).astype(f32)                           # [kh, kw]
    mcat = jnp.concatenate(
        [sum(wt[ki, kj] * gh[ki] for ki in range(4)) for kj in range(4)],
        axis=1).astype(cdt)                                               # [Ho, 4H]

    kernel = _make_kernel(H, W, chunk, cdt)
    out = pl.pallas_call(
        kernel,
        out_shape=jax.ShapeDtypeStruct((B, Ho, Wo), f32),
        grid_spec=pltpu.PrefetchScalarGridSpec(
            num_scalar_prefetch=0,
            grid=(B, n_strips),
            in_specs=[
                pl.BlockSpec((1, Cin, HW), lambda b, s: (b, 0, 0)),     # x (channel-major)
                pl.BlockSpec((9, C1, Cin), lambda b, s: (0, 0, 0)),     # w1 taps
                pl.BlockSpec((C1, 1), lambda b, s: (0, 0)),             # b1
                pl.BlockSpec((9, C2, C1), lambda b, s: (0, 0, 0)),      # w2 taps
                pl.BlockSpec((C2, 1), lambda b, s: (0, 0)),             # b2
                pl.BlockSpec((8, C2), lambda b, s: (0, 0)),             # w3 (padded)
                pl.BlockSpec((9, HW), lambda b, s: (0, 0)),             # border masks
                pl.BlockSpec((4, W, Wo), lambda b, s: (0, 0, 0)),       # GwT taps
                pl.BlockSpec((strip, 4 * H), lambda b, s: (s, 0)),      # Mcat strip
                pl.BlockSpec(memory_space=pltpu.MemorySpace.SMEM),      # [b3, bt]
            ],
            out_specs=pl.BlockSpec((1, strip, Wo), lambda b, s: (b, s, 0)),
        ),
        compiler_params=pltpu.CompilerParams(
            dimension_semantics=("parallel", "parallel"),
        ),
    )(x_cm, w1, b1, w2, b2, w3, masks, gwt, mcat, scal)

    return out.reshape(B, 1, Ho, Wo)


# ---------------------------------------------------------------------------
# Pure-JAX reference (mirrors the PyTorch forward)
# ---------------------------------------------------------------------------
def _bilinear_resize_ref(x, out_h, out_w):
    h, w = x.shape[-2], x.shape[-1]

    def coords(in_size, out_size):
        src = (jnp.arange(out_size, dtype=jnp.float32) + 0.5) * (in_size / out_size) - 0.5
        src = jnp.maximum(src, 0.0)
        i0 = jnp.minimum(jnp.floor(src).astype(jnp.int32), in_size - 1)
        i1 = jnp.minimum(i0 + 1, in_size - 1)
        return i0, i1, src - i0.astype(jnp.float32)

    r0, r1, rw = coords(h, out_h)
    c0, c1, cw = coords(w, out_w)
    xr = x[..., r0, :] * (1.0 - rw)[:, None] + x[..., r1, :] * rw[:, None]
    return xr[..., c0] * (1.0 - cw) + xr[..., c1] * cw


def _reference(x, params, out_hw=(224, 224)):
    dn = ("NCHW", "OIHW", "NCHW")
    hi = jax.lax.Precision.HIGHEST
    y = jax.lax.conv_general_dilated(x, params["w1"], (1, 1), ((1, 1), (1, 1)),
                                     dimension_numbers=dn, precision=hi)
    y = jnp.maximum(y + params["b1"].reshape(1, -1, 1, 1), 0.0)
    y = jax.lax.conv_general_dilated(y, params["w2"], (1, 1), ((1, 1), (1, 1)),
                                     dimension_numbers=dn, precision=hi)
    y = jnp.maximum(y + params["b2"].reshape(1, -1, 1, 1), 0.0)
    y = jax.lax.conv_general_dilated(y, params["w3"], (1, 1), ((0, 0), (0, 0)),
                                     dimension_numbers=dn, precision=hi)
    y = y + params["b3"].reshape(1, -1, 1, 1)
    # ConvTranspose2d(1,1,4,stride=2,padding=1): dilate input by 2, pad by
    # k - 1 - p = 2, then regular conv with the spatially flipped kernel.
    wt_flip = params["wt"][:, :, ::-1, ::-1]
    y = jax.lax.conv_general_dilated(y, wt_flip, (1, 1), ((2, 2), (2, 2)),
                                     lhs_dilation=(2, 2),
                                     dimension_numbers=dn, precision=hi)
    y = y + params["bt"].reshape(1, -1, 1, 1)
    return _bilinear_resize_ref(y, out_hw[0], out_hw[1])


# ---------------------------------------------------------------------------
if __name__ == "__main__":
    key = jax.random.PRNGKey(0)
    ks = jax.random.split(key, 9)

    # Scaled-down MaskHeadSmallConv: dim=32, context_dim=16, 16x16 feature map.
    B, Cin, H, W = 2, 32, 16, 16
    C1, C2 = 16, 8

    def rnd(k, shape, scale):
        return jax.random.normal(k, shape, dtype=jnp.float32) * scale

    params = {
        "w1": rnd(ks[0], (C1, Cin, 3, 3), 1.0 / np.sqrt(9 * Cin)),
        "b1": rnd(ks[1], (C1,), 0.1),
        "w2": rnd(ks[2], (C2, C1, 3, 3), 1.0 / np.sqrt(9 * C1)),
        "b2": rnd(ks[3], (C2,), 0.1),
        "w3": rnd(ks[4], (1, C2, 1, 1), 1.0 / np.sqrt(C2)),
        "b3": rnd(ks[5], (1,), 0.1),
        "wt": rnd(ks[6], (1, 1, 4, 4), 0.25),
        "bt": rnd(ks[7], (1,), 0.1),
    }
    x = jax.random.normal(ks[8], (B, Cin, H, W), dtype=jnp.float32)

    ref = jax.block_until_ready(_reference(x, params))

    # f32 MXU operands (safe on all generations): tight tolerance.
    out = jax.block_until_ready(mask_head_forward(x, params))
    assert out.shape == (B, 1, 224, 224)
    np.testing.assert_allclose(np.asarray(out), np.asarray(ref),
                               rtol=2e-4, atol=2e-4)

    # bf16 MXU operands (v6e/v7x fast path, f32 accumulation): looser tolerance.
    out_bf16 = jax.block_until_ready(
        mask_head_forward(x, params, mxu_dtype=jnp.bfloat16))
    np.testing.assert_allclose(np.asarray(out_bf16), np.asarray(ref),
                               rtol=5e-2, atol=5e-2)

    print("KERNEL_OK")
</pallas_src>

<mosaic_0001>
module attributes {stable_mosaic.version = 11 : i64} {
  func.func @kernel(%arg0: i32, %arg1: i32, %arg2: memref<1x32x256xf32, #tpu.memory_space<vmem>>, %arg3: memref<9x16x32xf32, #tpu.memory_space<vmem>>, %arg4: memref<16x1xf32, #tpu.memory_space<vmem>>, %arg5: memref<9x8x16xf32, #tpu.memory_space<vmem>>, %arg6: memref<8x1xf32, #tpu.memory_space<vmem>>, %arg7: memref<8x8xf32, #tpu.memory_space<vmem>>, %arg8: memref<9x256xf32, #tpu.memory_space<vmem>>, %arg9: memref<4x16x224xf32, #tpu.memory_space<vmem>>, %arg10: memref<112x64xf32, #tpu.memory_space<vmem>>, %arg11: memref<2xf32, #tpu.memory_space<smem>>, %arg12: memref<1x112x224xf32, #tpu.memory_space<vmem>>) attributes {dimension_semantics = [#tpu.dimension_semantics<parallel>, #tpu.dimension_semantics<parallel>], iteration_bounds = array<i64: 2, 2>, scalar_prefetch = 0 : i64, scratch_operands = 0 : i64, tpu.core_type = #tpu.core_type<tc>, window_params = [{transform_indices = @transform_0, window_bounds = array<i64: 1, 32, 256>}, {pipeline_mode = #tpu.pipeline_mode<synchronous>, transform_indices = @transform_1, window_bounds = array<i64: 9, 16, 32>}, {pipeline_mode = #tpu.pipeline_mode<synchronous>, transform_indices = @transform_2, window_bounds = array<i64: 16, 1>}, {pipeline_mode = #tpu.pipeline_mode<synchronous>, transform_indices = @transform_3, window_bounds = array<i64: 9, 8, 16>}, {pipeline_mode = #tpu.pipeline_mode<synchronous>, transform_indices = @transform_4, window_bounds = array<i64: 8, 1>}, {pipeline_mode = #tpu.pipeline_mode<synchronous>, transform_indices = @transform_5, window_bounds = array<i64: 8, 8>}, {pipeline_mode = #tpu.pipeline_mode<synchronous>, transform_indices = @transform_6, window_bounds = array<i64: 9, 256>}, {pipeline_mode = #tpu.pipeline_mode<synchronous>, transform_indices = @transform_7, window_bounds = array<i64: 4, 16, 224>}, {transform_indices = @transform_8, window_bounds = array<i64: 112, 64>}, {transform_indices = @transform_9, window_bounds = array<i64: 2>}, {transform_indices = @transform_10, window_bounds = array<i64: 1, 112, 224>}]} {
    %c0 = arith.constant 0 : index
    %c0_0 = arith.constant 0 : index
    %c0_1 = arith.constant 0 : index
    %0 = vector.load %arg2[%c0, %c0_0, %c0_1] : memref<1x32x256xf32, #tpu.memory_space<vmem>>, vector<1x32x256xf32>
    %1 = vector.shape_cast %0 : vector<1x32x256xf32> to vector<32x256xf32>
    %cst = arith.constant 0.000000e+00 : f32
    %2 = vector.broadcast %cst : f32 to vector<16x256xf32>
    %c17_i32 = arith.constant 17 : i32
    %3 = tpu.dynamic_rotate %1 by %c17_i32 dim 1 : vector<32x256xf32>, i32 -> vector<32x256xf32>
    %c0_2 = arith.constant 0 : index
    %c0_3 = arith.constant 0 : index
    %c0_4 = arith.constant 0 : index
    %4 = vector.load %arg3[%c0_2, %c0_3, %c0_4] : memref<9x16x32xf32, #tpu.memory_space<vmem>>, vector<1x16x32xf32>
    %5 = vector.shape_cast %4 : vector<1x16x32xf32> to vector<16x32xf32>
    %cst_5 = arith.constant dense<0.000000e+00> : vector<16x256xf32>
    %6 = tpu.matmul %5, %3, %cst_5 {dimension_numbers = #tpu.dot_dimension_numbers<[1], [0], [0], [1], [0, 0, 1, 1], [], []>} : vector<16x32xf32>, vector<32x256xf32>, vector<16x256xf32> -> vector<16x256xf32>
    %c0_6 = arith.constant 0 : index
    %c0_7 = arith.constant 0 : index
    %7 = vector.load %arg8[%c0_6, %c0_7] : memref<9x256xf32, #tpu.memory_space<vmem>>, vector<1x256xf32>
    %8 = vector.shape_cast %7 : vector<1x256xf32> to vector<256xf32>
    %9 = vector.shape_cast %8 : vector<256xf32> to vector<1x256xf32>
    %10 = vector.broadcast %9 : vector<1x256xf32> to vector<16x256xf32>
    %11 = arith.mulf %10, %6 : vector<16x256xf32>
    %12 = arith.addf %2, %11 : vector<16x256xf32>
    %c16_i32 = arith.constant 16 : i32
    %13 = tpu.dynamic_rotate %1 by %c16_i32 dim 1 : vector<32x256xf32>, i32 -> vector<32x256xf32>
    %c1 = arith.constant 1 : index
    %c0_8 = arith.constant 0 : index
    %c0_9 = arith.constant 0 : index
    %14 = vector.load %arg3[%c1, %c0_8, %c0_9] : memref<9x16x32xf32, #tpu.memory_space<vmem>>, vector<1x16x32xf32>
    %15 = vector.shape_cast %14 : vector<1x16x32xf32> to vector<16x32xf32>
    %cst_10 = arith.constant dense<0.000000e+00> : vector<16x256xf32>
    %16 = tpu.matmul %15, %13, %cst_10 {dimension_numbers = #tpu.dot_dimension_numbers<[1], [0], [0], [1], [0, 0, 1, 1], [], []>} : vector<16x32xf32>, vector<32x256xf32>, vector<16x256xf32> -> vector<16x256xf32>
    %c1_11 = arith.constant 1 : index
    %c0_12 = arith.constant 0 : index
    %17 = vector.load %arg8[%c1_11, %c0_12] : memref<9x256xf32, #tpu.memory_space<vmem>>, vector<1x256xf32>
    %18 = vector.shape_cast %17 : vector<1x256xf32> to vector<256xf32>
    %19 = vector.shape_cast %18 : vector<256xf32> to vector<1x256xf32>
    %20 = vector.broadcast %19 : vector<1x256xf32> to vector<16x256xf32>
    %21 = arith.mulf %20, %16 : vector<16x256xf32>
    %22 = arith.addf %12, %21 : vector<16x256xf32>
    %c15_i32 = arith.constant 15 : i32
    %23 = tpu.dynamic_rotate %1 by %c15_i32 dim 1 : vector<32x256xf32>, i32 -> vector<32x256xf32>
    %c2 = arith.constant 2 : index
    %c0_13 = arith.constant 0 : index
    %c0_14 = arith.constant 0 : index
    %24 = vector.load %arg3[%c2, %c0_13, %c0_14] : memref<9x16x32xf32, #tpu.memory_space<vmem>>, vector<1x16x32xf32>
    %25 = vector.shape_cast %24 : vector<1x16x32xf32> to vector<16x32xf32>
    %cst_15 = arith.constant dense<0.000000e+00> : vector<16x256xf32>
    %26 = tpu.matmul %25, %23, %cst_15 {dimension_numbers = #tpu.dot_dimension_numbers<[1], [0], [0], [1], [0, 0, 1, 1], [], []>} : vector<16x32xf32>, vector<32x256xf32>, vector<16x256xf32> -> vector<16x256xf32>
    %c2_16 = arith.constant 2 : index
    %c0_17 = arith.constant 0 : index
    %27 = vector.load %arg8[%c2_16, %c0_17] : memref<9x256xf32, #tpu.memory_space<vmem>>, vector<1x256xf32>
    %28 = vector.shape_cast %27 : vector<1x256xf32> to vector<256xf32>
    %29 = vector.shape_cast %28 : vector<256xf32> to vector<1x256xf32>
    %30 = vector.broadcast %29 : vector<1x256xf32> to vector<16x256xf32>
    %31 = arith.mulf %30, %26 : vector<16x256xf32>
    %32 = arith.addf %22, %31 : vector<16x256xf32>
    %c1_i32 = arith.constant 1 : i32
    %33 = tpu.dynamic_rotate %1 by %c1_i32 dim 1 : vector<32x256xf32>, i32 -> vector<32x256xf32>
    %c3 = arith.constant 3 : index
    %c0_18 = arith.constant 0 : index
    %c0_19 = arith.constant 0 : index
    %34 = vector.load %arg3[%c3, %c0_18, %c0_19] : memref<9x16x32xf32, #tpu.memory_space<vmem>>, vector<1x16x32xf32>
    %35 = vector.shape_cast %34 : vector<1x16x32xf32> to vector<16x32xf32>
    %cst_20 = arith.constant dense<0.000000e+00> : vector<16x256xf32>
    %36 = tpu.matmul %35, %33, %cst_20 {dimension_numbers = #tpu.dot_dimension_numbers<[1], [0], [0], [1], [0, 0, 1, 1], [], []>} : vector<16x32xf32>, vector<32x256xf32>, vector<16x256xf32> -> vector<16x256xf32>
    %c3_21 = arith.constant 3 : index
    %c0_22 = arith.constant 0 : index
    %37 = vector.load %arg8[%c3_21, %c0_22] : memref<9x256xf32, #tpu.memory_space<vmem>>, vector<1x256xf32>
    %38 = vector.shape_cast %37 : vector<1x256xf32> to vector<256xf32>
    %39 = vector.shape_cast %38 : vector<256xf32> to vector<1x256xf32>
    %40 = vector.broadcast %39 : vector<1x256xf32> to vector<16x256xf32>
    %41 = arith.mulf %40, %36 : vector<16x256xf32>
    %42 = arith.addf %32, %41 : vector<16x256xf32>
    %c4 = arith.constant 4 : index
    %c0_23 = arith.constant 0 : index
    %c0_24 = arith.constant 0 : index
    %43 = vector.load %arg3[%c4, %c0_23, %c0_24] : memref<9x16x32xf32, #tpu.memory_space<vmem>>, vector<1x16x32xf32>
    %44 = vector.shape_cast %43 : vector<1x16x32xf32> to vector<16x32xf32>
    %cst_25 = arith.constant dense<0.000000e+00> : vector<16x256xf32>
    %45 = tpu.matmul %44, %1, %cst_25 {dimension_numbers = #tpu.dot_dimension_numbers<[1], [0], [0], [1], [0, 0, 1, 1], [], []>} : vector<16x32xf32>, vector<32x256xf32>, vector<16x256xf32> -> vector<16x256xf32>
    %46 = arith.addf %42, %45 : vector<16x256xf32>
    %c255_i32 = arith.constant 255 : i32
    %47 = tpu.dynamic_rotate %1 by %c255_i32 dim 1 : vector<32x256xf32>, i32 -> vector<32x256xf32>
    %c5 = arith.constant 5 : index
    %c0_26 = arith.constant 0 : index
    %c0_27 = arith.constant 0 : index
    %48 = vector.load %arg3[%c5, %c0_26, %c0_27] : memref<9x16x32xf32, #tpu.memory_space<vmem>>, vector<1x16x32xf32>
    %49 = vector.shape_cast %48 : vector<1x16x32xf32> to vector<16x32xf32>
    %cst_28 = arith.constant dense<0.000000e+00> : vector<16x256xf32>
    %50 = tpu.matmul %49, %47, %cst_28 {dimension_numbers = #tpu.dot_dimension_numbers<[1], [0], [0], [1], [0, 0, 1, 1], [], []>} : vector<16x32xf32>, vector<32x256xf32>, vector<16x256xf32> -> vector<16x256xf32>
    %c5_29 = arith.constant 5 : index
    %c0_30 = arith.constant 0 : index
    %51 = vector.load %arg8[%c5_29, %c0_30] : memref<9x256xf32, #tpu.memory_space<vmem>>, vector<1x256xf32>
    %52 = vector.shape_cast %51 : vector<1x256xf32> to vector<256xf32>
    %53 = vector.shape_cast %52 : vector<256xf32> to vector<1x256xf32>
    %54 = vector.broadcast %53 : vector<1x256xf32> to vector<16x256xf32>
    %55 = arith.mulf %54, %50 : vector<16x256xf32>
    %56 = arith.addf %46, %55 : vector<16x256xf32>
    %c241_i32 = arith.constant 241 : i32
    %57 = tpu.dynamic_rotate %1 by %c241_i32 dim 1 : vector<32x256xf32>, i32 -> vector<32x256xf32>
    %c6 = arith.constant 6 : index
    %c0_31 = arith.constant 0 : index
    %c0_32 = arith.constant 0 : index
    %58 = vector.load %arg3[%c6, %c0_31, %c0_32] : memref<9x16x32xf32, #tpu.memory_space<vmem>>, vector<1x16x32xf32>
    %59 = vector.shape_cast %58 : vector<1x16x32xf32> to vector<16x32xf32>
    %cst_33 = arith.constant dense<0.000000e+00> : vector<16x256xf32>
    %60 = tpu.matmul %59, %57, %cst_33 {dimension_numbers = #tpu.dot_dimension_numbers<[1], [0], [0], [1], [0, 0, 1, 1], [], []>} : vector<16x32xf32>, vector<32x256xf32>, vector<16x256xf32> -> vector<16x256xf32>
    %c6_34 = arith.constant 6 : index
    %c0_35 = arith.constant 0 : index
    %61 = vector.load %arg8[%c6_34, %c0_35] : memref<9x256xf32, #tpu.memory_space<vmem>>, vector<1x256xf32>
    %62 = vector.shape_cast %61 : vector<1x256xf32> to vector<256xf32>
    %63 = vector.shape_cast %62 : vector<256xf32> to vector<1x256xf32>
    %64 = vector.broadcast %63 : vector<1x256xf32> to vector<16x256xf32>
    %65 = arith.mulf %64, %60 : vector<16x256xf32>
    %66 = arith.addf %56, %65 : vector<16x256xf32>
    %c240_i32 = arith.constant 240 : i32
    %67 = tpu.dynamic_rotate %1 by %c240_i32 dim 1 : vector<32x256xf32>, i32 -> vector<32x256xf32>
    %c7 = arith.constant 7 : index
    %c0_36 = arith.constant 0 : index
    %c0_37 = arith.constant 0 : index
    %68 = vector.load %arg3[%c7, %c0_36, %c0_37] : memref<9x16x32xf32, #tpu.memory_space<vmem>>, vector<1x16x32xf32>
    %69 = vector.shape_cast %68 : vector<1x16x32xf32> to vector<16x32xf32>
    %cst_38 = arith.constant dense<0.000000e+00> : vector<16x256xf32>
    %70 = tpu.matmul %69, %67, %cst_38 {dimension_numbers = #tpu.dot_dimension_numbers<[1], [0], [0], [1], [0, 0, 1, 1], [], []>} : vector<16x32xf32>, vector<32x256xf32>, vector<16x256xf32> -> vector<16x256xf32>
    %c7_39 = arith.constant 7 : index
    %c0_40 = arith.constant 0 : index
    %71 = vector.load %arg8[%c7_39, %c0_40] : memref<9x256xf32, #tpu.memory_space<vmem>>, vector<1x256xf32>
    %72 = vector.shape_cast %71 : vector<1x256xf32> to vector<256xf32>
    %73 = vector.shape_cast %72 : vector<256xf32> to vector<1x256xf32>
    %74 = vector.broadcast %73 : vector<1x256xf32> to vector<16x256xf32>
    %75 = arith.mulf %74, %70 : vector<16x256xf32>
    %76 = arith.addf %66, %75 : vector<16x256xf32>
    %c239_i32 = arith.constant 239 : i32
    %77 = tpu.dynamic_rotate %1 by %c239_i32 dim 1 : vector<32x256xf32>, i32 -> vector<32x256xf32>
    %c8 = arith.constant 8 : index
    %c0_41 = arith.constant 0 : index
    %c0_42 = arith.constant 0 : index
    %78 = vector.load %arg3[%c8, %c0_41, %c0_42] : memref<9x16x32xf32, #tpu.memory_space<vmem>>, vector<1x16x32xf32>
    %79 = vector.shape_cast %78 : vector<1x16x32xf32> to vector<16x32xf32>
    %cst_43 = arith.constant dense<0.000000e+00> : vector<16x256xf32>
    %80 = tpu.matmul %79, %77, %cst_43 {dimension_numbers = #tpu.dot_dimension_numbers<[1], [0], [0], [1], [0, 0, 1, 1], [], []>} : vector<16x32xf32>, vector<32x256xf32>, vector<16x256xf32> -> vector<16x256xf32>
    %c8_44 = arith.constant 8 : index
    %c0_45 = arith.constant 0 : index
    %81 = vector.load %arg8[%c8_44, %c0_45] : memref<9x256xf32, #tpu.memory_space<vmem>>, vector<1x256xf32>
    %82 = vector.shape_cast %81 : vector<1x256xf32> to vector<256xf32>
    %83 = vector.shape_cast %82 : vector<256xf32> to vector<1x256xf32>
    %84 = vector.broadcast %83 : vector<1x256xf32> to vector<16x256xf32>
    %85 = arith.mulf %84, %80 : vector<16x256xf32>
    %86 = arith.addf %76, %85 : vector<16x256xf32>
    %c0_46 = arith.constant 0 : index
    %c0_47 = arith.constant 0 : index
    %87 = vector.load %arg4[%c0_46, %c0_47] : memref<16x1xf32, #tpu.memory_space<vmem>>, vector<16x1xf32>
    %88 = vector.broadcast %87 : vector<16x1xf32> to vector<16x256xf32>
    %89 = arith.addf %86, %88 : vector<16x256xf32>
    %cst_48 = arith.constant 0.000000e+00 : f32
    %90 = vector.broadcast %cst_48 : f32 to vector<16x256xf32>
    %91 = arith.maximumf %89, %90 : vector<16x256xf32>
    %cst_49 = arith.constant 0.000000e+00 : f32
    %92 = vector.broadcast %cst_49 : f32 to vector<8x256xf32>
    %c17_i32_50 = arith.constant 17 : i32
    %93 = tpu.dynamic_rotate %91 by %c17_i32_50 dim 1 : vector<16x256xf32>, i32 -> vector<16x256xf32>
    %c0_51 = arith.constant 0 : index
    %c0_52 = arith.constant 0 : index
    %c0_53 = arith.constant 0 : index
    %94 = vector.load %arg5[%c0_51, %c0_52, %c0_53] : memref<9x8x16xf32, #tpu.memory_space<vmem>>, vector<1x8x16xf32>
    %95 = vector.shape_cast %94 : vector<1x8x16xf32> to vector<8x16xf32>
    %cst_54 = arith.constant dense<0.000000e+00> : vector<8x256xf32>
    %96 = tpu.matmul %95, %93, %cst_54 {dimension_numbers = #tpu.dot_dimension_numbers<[1], [0], [0], [1], [0, 0, 1, 1], [], []>} : vector<8x16xf32>, vector<16x256xf32>, vector<8x256xf32> -> vector<8x256xf32>
    %c0_55 = arith.constant 0 : index
    %c0_56 = arith.constant 0 : index
    %97 = vector.load %arg8[%c0_55, %c0_56] : memref<9x256xf32, #tpu.memory_space<vmem>>, vector<1x256xf32>
    %98 = vector.shape_cast %97 : vector<1x256xf32> to vector<256xf32>
    %99 = vector.shape_cast %98 : vector<256xf32> to vector<1x256xf32>
    %100 = vector.broadcast %99 : vector<1x256xf32> to vector<8x256xf32>
    %101 = arith.mulf %100, %96 : vector<8x256xf32>
    %102 = arith.addf %92, %101 : vector<8x256xf32>
    %c16_i32_57 = arith.constant 16 : i32
    %103 = tpu.dynamic_rotate %91 by %c16_i32_57 dim 1 : vector<16x256xf32>, i32 -> vector<16x256xf32>
    %c1_58 = arith.constant 1 : index
    %c0_59 = arith.constant 0 : index
    %c0_60 = arith.constant 0 : index
    %104 = vector.load %arg5[%c1_58, %c0_59, %c0_60] : memref<9x8x16xf32, #tpu.memory_space<vmem>>, vector<1x8x16xf32>
    %105 = vector.shape_cast %104 : vector<1x8x16xf32> to vector<8x16xf32>
    %cst_61 = arith.constant dense<0.000000e+00> : vector<8x256xf32>
    %106 = tpu.matmul %105, %103, %cst_61 {dimension_numbers = #tpu.dot_dimension_numbers<[1], [0], [0], [1], [0, 0, 1, 1], [], []>} : vector<8x16xf32>, vector<16x256xf32>, vector<8x256xf32> -> vector<8x256xf32>
    %c1_62 = arith.constant 1 : index
    %c0_63 = arith.constant 0 : index
    %107 = vector.load %arg8[%c1_62, %c0_63] : memref<9x256xf32, #tpu.memory_space<vmem>>, vector<1x256xf32>
    %108 = vector.shape_cast %107 : vector<1x256xf32> to vector<256xf32>
    %109 = vector.shape_cast %108 : vector<256xf32> to vector<1x256xf32>
    %110 = vector.broadcast %109 : vector<1x256xf32> to vector<8x256xf32>
    %111 = arith.mulf %110, %106 : vector<8x256xf32>
    %112 = arith.addf %102, %111 : vector<8x256xf32>
    %c15_i32_64 = arith.constant 15 : i32
    %113 = tpu.dynamic_rotate %91 by %c15_i32_64 dim 1 : vector<16x256xf32>, i32 -> vector<16x256xf32>
    %c2_65 = arith.constant 2 : index
    %c0_66 = arith.constant 0 : index
    %c0_67 = arith.constant 0 : index
    %114 = vector.load %arg5[%c2_65, %c0_66, %c0_67] : memref<9x8x16xf32, #tpu.memory_space<vmem>>, vector<1x8x16xf32>
    %115 = vector.shape_cast %114 : vector<1x8x16xf32> to vector<8x16xf32>
    %cst_68 = arith.constant dense<0.000000e+00> : vector<8x256xf32>
    %116 = tpu.matmul %115, %113, %cst_68 {dimension_numbers = #tpu.dot_dimension_numbers<[1], [0], [0], [1], [0, 0, 1, 1], [], []>} : vector<8x16xf32>, vector<16x256xf32>, vector<8x256xf32> -> vector<8x256xf32>
    %c2_69 = arith.constant 2 : index
    %c0_70 = arith.constant 0 : index
    %117 = vector.load %arg8[%c2_69, %c0_70] : memref<9x256xf32, #tpu.memory_space<vmem>>, vector<1x256xf32>
    %118 = vector.shape_cast %117 : vector<1x256xf32> to vector<256xf32>
    %119 = vector.shape_cast %118 : vector<256xf32> to vector<1x256xf32>
    %120 = vector.broadcast %119 : vector<1x256xf32> to vector<8x256xf32>
    %121 = arith.mulf %120, %116 : vector<8x256xf32>
    %122 = arith.addf %112, %121 : vector<8x256xf32>
    %c1_i32_71 = arith.constant 1 : i32
    %123 = tpu.dynamic_rotate %91 by %c1_i32_71 dim 1 : vector<16x256xf32>, i32 -> vector<16x256xf32>
    %c3_72 = arith.constant 3 : index
    %c0_73 = arith.constant 0 : index
    %c0_74 = arith.constant 0 : index
    %124 = vector.load %arg5[%c3_72, %c0_73, %c0_74] : memref<9x8x16xf32, #tpu.memory_space<vmem>>, vector<1x8x16xf32>
    %125 = vector.shape_cast %124 : vector<1x8x16xf32> to vector<8x16xf32>
    %cst_75 = arith.constant dense<0.000000e+00> : vector<8x256xf32>
    %126 = tpu.matmul %125, %123, %cst_75 {dimension_numbers = #tpu.dot_dimension_numbers<[1], [0], [0], [1], [0, 0, 1, 1], [], []>} : vector<8x16xf32>, vector<16x256xf32>, vector<8x256xf32> -> vector<8x256xf32>
    %c3_76 = arith.constant 3 : index
    %c0_77 = arith.constant 0 : index
    %127 = vector.load %arg8[%c3_76, %c0_77] : memref<9x256xf32, #tpu.memory_space<vmem>>, vector<1x256xf32>
    %128 = vector.shape_cast %127 : vector<1x256xf32> to vector<256xf32>
    %129 = vector.shape_cast %128 : vector<256xf32> to vector<1x256xf32>
    %130 = vector.broadcast %129 : vector<1x256xf32> to vector<8x256xf32>
    %131 = arith.mulf %130, %126 : vector<8x256xf32>
    %132 = arith.addf %122, %131 : vector<8x256xf32>
    %c4_78 = arith.constant 4 : index
    %c0_79 = arith.constant 0 : index
    %c0_80 = arith.constant 0 : index
    %133 = vector.load %arg5[%c4_78, %c0_79, %c0_80] : memref<9x8x16xf32, #tpu.memory_space<vmem>>, vector<1x8x16xf32>
    %134 = vector.shape_cast %133 : vector<1x8x16xf32> to vector<8x16xf32>
    %cst_81 = arith.constant dense<0.000000e+00> : vector<8x256xf32>
    %135 = tpu.matmul %134, %91, %cst_81 {dimension_numbers = #tpu.dot_dimension_numbers<[1], [0], [0], [1], [0, 0, 1, 1], [], []>} : vector<8x16xf32>, vector<16x256xf32>, vector<8x256xf32> -> vector<8x256xf32>
    %136 = arith.addf %132, %135 : vector<8x256xf32>
    %c255_i32_82 = arith.constant 255 : i32
    %137 = tpu.dynamic_rotate %91 by %c255_i32_82 dim 1 : vector<16x256xf32>, i32 -> vector<16x256xf32>
    %c5_83 = arith.constant 5 : index
    %c0_84 = arith.constant 0 : index
    %c0_85 = arith.constant 0 : index
    %138 = vector.load %arg5[%c5_83, %c0_84, %c0_85] : memref<9x8x16xf32, #tpu.memory_space<vmem>>, vector<1x8x16xf32>
    %139 = vector.shape_cast %138 : vector<1x8x16xf32> to vector<8x16xf32>
    %cst_86 = arith.constant dense<0.000000e+00> : vector<8x256xf32>
    %140 = tpu.matmul %139, %137, %cst_86 {dimension_numbers = #tpu.dot_dimension_numbers<[1], [0], [0], [1], [0, 0, 1, 1], [], []>} : vector<8x16xf32>, vector<16x256xf32>, vector<8x256xf32> -> vector<8x256xf32>
    %c5_87 = arith.constant 5 : index
    %c0_88 = arith.constant 0 : index
    %141 = vector.load %arg8[%c5_87, %c0_88] : memref<9x256xf32, #tpu.memory_space<vmem>>, vector<1x256xf32>
    %142 = vector.shape_cast %141 : vector<1x256xf32> to vector<256xf32>
    %143 = vector.shape_cast %142 : vector<256xf32> to vector<1x256xf32>
    %144 = vector.broadcast %143 : vector<1x256xf32> to vector<8x256xf32>
    %145 = arith.mulf %144, %140 : vector<8x256xf32>
    %146 = arith.addf %136, %145 : vector<8x256xf32>
    %c241_i32_89 = arith.constant 241 : i32
    %147 = tpu.dynamic_rotate %91 by %c241_i32_89 dim 1 : vector<16x256xf32>, i32 -> vector<16x256xf32>
    %c6_90 = arith.constant 6 : index
    %c0_91 = arith.constant 0 : index
    %c0_92 = arith.constant 0 : index
    %148 = vector.load %arg5[%c6_90, %c0_91, %c0_92] : memref<9x8x16xf32, #tpu.memory_space<vmem>>, vector<1x8x16xf32>
    %149 = vector.shape_cast %148 : vector<1x8x16xf32> to vector<8x16xf32>
    %cst_93 = arith.constant dense<0.000000e+00> : vector<8x256xf32>
    %150 = tpu.matmul %149, %147, %cst_93 {dimension_numbers = #tpu.dot_dimension_numbers<[1], [0], [0], [1], [0, 0, 1, 1], [], []>} : vector<8x16xf32>, vector<16x256xf32>, vector<8x256xf32> -> vector<8x256xf32>
    %c6_94 = arith.constant 6 : index
    %c0_95 = arith.constant 0 : index
    %151 = vector.load %arg8[%c6_94, %c0_95] : memref<9x256xf32, #tpu.memory_space<vmem>>, vector<1x256xf32>
    %152 = vector.shape_cast %151 : vector<1x256xf32> to vector<256xf32>
    %153 = vector.shape_cast %152 : vector<256xf32> to vector<1x256xf32>
    %154 = vector.broadcast %153 : vector<1x256xf32> to vector<8x256xf32>
    %155 = arith.mulf %154, %150 : vector<8x256xf32>
    %156 = arith.addf %146, %155 : vector<8x256xf32>
    %c240_i32_96 = arith.constant 240 : i32
    %157 = tpu.dynamic_rotate %91 by %c240_i32_96 dim 1 : vector<16x256xf32>, i32 -> vector<16x256xf32>
    %c7_97 = arith.constant 7 : index
    %c0_98 = arith.constant 0 : index
    %c0_99 = arith.constant 0 : index
    %158 = vector.load %arg5[%c7_97, %c0_98, %c0_99] : memref<9x8x16xf32, #tpu.memory_space<vmem>>, vector<1x8x16xf32>
    %159 = vector.shape_cast %158 : vector<1x8x16xf32> to vector<8x16xf32>
    %cst_100 = arith.constant dense<0.000000e+00> : vector<8x256xf32>
    %160 = tpu.matmul %159, %157, %cst_100 {dimension_numbers = #tpu.dot_dimension_numbers<[1], [0], [0], [1], [0, 0, 1, 1], [], []>} : vector<8x16xf32>, vector<16x256xf32>, vector<8x256xf32> -> vector<8x256xf32>
    %c7_101 = arith.constant 7 : index
    %c0_102 = arith.constant 0 : index
    %161 = vector.load %arg8[%c7_101, %c0_102] : memref<9x256xf32, #tpu.memory_space<vmem>>, vector<1x256xf32>
    %162 = vector.shape_cast %161 : vector<1x256xf32> to vector<256xf32>
    %163 = vector.shape_cast %162 : vector<256xf32> to vector<1x256xf32>
    %164 = vector.broadcast %163 : vector<1x256xf32> to vector<8x256xf32>
    %165 = arith.mulf %164, %160 : vector<8x256xf32>
    %166 = arith.addf %156, %165 : vector<8x256xf32>
    %c239_i32_103 = arith.constant 239 : i32
    %167 = tpu.dynamic_rotate %91 by %c239_i32_103 dim 1 : vector<16x256xf32>, i32 -> vector<16x256xf32>
    %c8_104 = arith.constant 8 : index
    %c0_105 = arith.constant 0 : index
    %c0_106 = arith.constant 0 : index
    %168 = vector.load %arg5[%c8_104, %c0_105, %c0_106] : memref<9x8x16xf32, #tpu.memory_space<vmem>>, vector<1x8x16xf32>
    %169 = vector.shape_cast %168 : vector<1x8x16xf32> to vector<8x16xf32>
    %cst_107 = arith.constant dense<0.000000e+00> : vector<8x256xf32>
    %170 = tpu.matmul %169, %167, %cst_107 {dimension_numbers = #tpu.dot_dimension_numbers<[1], [0], [0], [1], [0, 0, 1, 1], [], []>} : vector<8x16xf32>, vector<16x256xf32>, vector<8x256xf32> -> vector<8x256xf32>
    %c8_108 = arith.constant 8 : index
    %c0_109 = arith.constant 0 : index
    %171 = vector.load %arg8[%c8_108, %c0_109] : memref<9x256xf32, #tpu.memory_space<vmem>>, vector<1x256xf32>
    %172 = vector.shape_cast %171 : vector<1x256xf32> to vector<256xf32>
    %173 = vector.shape_cast %172 : vector<256xf32> to vector<1x256xf32>
    %174 = vector.broadcast %173 : vector<1x256xf32> to vector<8x256xf32>
    %175 = arith.mulf %174, %170 : vector<8x256xf32>
    %176 = arith.addf %166, %175 : vector<8x256xf32>
    %c0_110 = arith.constant 0 : index
    %c0_111 = arith.constant 0 : index
    %177 = vector.load %arg6[%c0_110, %c0_111] : memref<8x1xf32, #tpu.memory_space<vmem>>, vector<8x1xf32>
    %178 = vector.broadcast %177 : vector<8x1xf32> to vector<8x256xf32>
    %179 = arith.addf %176, %178 : vector<8x256xf32>
    %cst_112 = arith.constant 0.000000e+00 : f32
    %180 = vector.broadcast %cst_112 : f32 to vector<8x256xf32>
    %181 = arith.maximumf %179, %180 : vector<8x256xf32>
    %c0_113 = arith.constant 0 : index
    %c0_114 = arith.constant 0 : index
    %182 = vector.load %arg7[%c0_113, %c0_114] : memref<8x8xf32, #tpu.memory_space<vmem>>, vector<8x8xf32>
    %cst_115 = arith.constant dense<0.000000e+00> : vector<8x256xf32>
    %183 = tpu.matmul %182, %181, %cst_115 {dimension_numbers = #tpu.dot_dimension_numbers<[1], [0], [0], [1], [0, 0, 1, 1], [], []>} : vector<8x8xf32>, vector<8x256xf32>, vector<8x256xf32> -> vector<8x256xf32>
    %184 = vector.extract_strided_slice %183 {offsets = [0, 0], sizes = [1, 256], strides = [1, 1]} : vector<8x256xf32> to vector<1x256xf32>
    %c0_116 = arith.constant 0 : index
    %185 = memref.load %arg11[%c0_116] : memref<2xf32, #tpu.memory_space<smem>>
    %186 = vector.broadcast %185 : f32 to vector<1x256xf32>
    %187 = arith.addf %184, %186 : vector<1x256xf32>
    %188 = vector.extract_strided_slice %187 {offsets = [0, 0], sizes = [1, 16], strides = [1, 1]} : vector<1x256xf32> to vector<1x16xf32>
    %189 = vector.extract_strided_slice %187 {offsets = [0, 16], sizes = [1, 16], strides = [1, 1]} : vector<1x256xf32> to vector<1x16xf32>
    %190 = vector.extract_strided_slice %187 {offsets = [0, 32], sizes = [1, 16], strides = [1, 1]} : vector<1x256xf32> to vector<1x16xf32>
    %191 = vector.extract_strided_slice %187 {offsets = [0, 48], sizes = [1, 16], strides = [1, 1]} : vector<1x256xf32> to vector<1x16xf32>
    %192 = vector.extract_strided_slice %187 {offsets = [0, 64], sizes = [1, 16], strides = [1, 1]} : vector<1x256xf32> to vector<1x16xf32>
    %193 = vector.extract_strided_slice %187 {offsets = [0, 80], sizes = [1, 16], strides = [1, 1]} : vector<1x256xf32> to vector<1x16xf32>
    %194 = vector.extract_strided_slice %187 {offsets = [0, 96], sizes = [1, 16], strides = [1, 1]} : vector<1x256xf32> to vector<1x16xf32>
    %195 = vector.extract_strided_slice %187 {offsets = [0, 112], sizes = [1, 16], strides = [1, 1]} : vector<1x256xf32> to vector<1x16xf32>
    %196 = vector.extract_strided_slice %187 {offsets = [0, 128], sizes = [1, 16], strides = [1, 1]} : vector<1x256xf32> to vector<1x16xf32>
    %197 = vector.extract_strided_slice %187 {offsets = [0, 144], sizes = [1, 16], strides = [1, 1]} : vector<1x256xf32> to vector<1x16xf32>
    %198 = vector.extract_strided_slice %187 {offsets = [0, 160], sizes = [1, 16], strides = [1, 1]} : vector<1x256xf32> to vector<1x16xf32>
    %199 = vector.extract_strided_slice %187 {offsets = [0, 176], sizes = [1, 16], strides = [1, 1]} : vector<1x256xf32> to vector<1x16xf32>
    %200 = vector.extract_strided_slice %187 {offsets = [0, 192], sizes = [1, 16], strides = [1, 1]} : vector<1x256xf32> to vector<1x16xf32>
    %201 = vector.extract_strided_slice %187 {offsets = [0, 208], sizes = [1, 16], strides = [1, 1]} : vector<1x256xf32> to vector<1x16xf32>
    %202 = vector.extract_strided_slice %187 {offsets = [0, 224], sizes = [1, 16], strides = [1, 1]} : vector<1x256xf32> to vector<1x16xf32>
    %203 = vector.extract_strided_slice %187 {offsets = [0, 240], sizes = [1, 16], strides = [1, 1]} : vector<1x256xf32> to vector<1x16xf32>
    %204 = tpu.concatenate %188, %189, %190, %191, %192, %193, %194, %195, %196, %197, %198, %199, %200, %201, %202, %203 in 0 : vector<1x16xf32>, vector<1x16xf32>, vector<1x16xf32>, vector<1x16xf32>, vector<1x16xf32>, vector<1x16xf32>, vector<1x16xf32>, vector<1x16xf32>, vector<1x16xf32>, vector<1x16xf32>, vector<1x16xf32>, vector<1x16xf32>, vector<1x16xf32>, vector<1x16xf32>, vector<1x16xf32>, vector<1x16xf32> -> vector<16x16xf32>
    %c0_117 = arith.constant 0 : index
    %c0_118 = arith.constant 0 : index
    %c0_119 = arith.constant 0 : index
    %205 = vector.load %arg9[%c0_117, %c0_118, %c0_119] : memref<4x16x224xf32, #tpu.memory_space<vmem>>, vector<1x16x224xf32>
    %206 = vector.shape_cast %205 : vector<1x16x224xf32> to vector<16x224xf32>
    %cst_120 = arith.constant dense<0.000000e+00> : vector<16x224xf32>
    %207 = tpu.matmul %204, %206, %cst_120 {dimension_numbers = #tpu.dot_dimension_numbers<[1], [0], [0], [1], [0, 0, 1, 1], [], []>} : vector<16x16xf32>, vector<16x224xf32>, vector<16x224xf32> -> vector<16x224xf32>
    %c1_121 = arith.constant 1 : index
    %c0_122 = arith.constant 0 : index
    %c0_123 = arith.constant 0 : index
    %208 = vector.load %arg9[%c1_121, %c0_122, %c0_123] : memref<4x16x224xf32, #tpu.memory_space<vmem>>, vector<1x16x224xf32>
    %209 = vector.shape_cast %208 : vector<1x16x224xf32> to vector<16x224xf32>
    %cst_124 = arith.constant dense<0.000000e+00> : vector<16x224xf32>
    %210 = tpu.matmul %204, %209, %cst_124 {dimension_numbers = #tpu.dot_dimension_numbers<[1], [0], [0], [1], [0, 0, 1, 1], [], []>} : vector<16x16xf32>, vector<16x224xf32>, vector<16x224xf32> -> vector<16x224xf32>
    %c2_125 = arith.constant 2 : index
    %c0_126 = arith.constant 0 : index
    %c0_127 = arith.constant 0 : index
    %211 = vector.load %arg9[%c2_125, %c0_126, %c0_127] : memref<4x16x224xf32, #tpu.memory_space<vmem>>, vector<1x16x224xf32>
    %212 = vector.shape_cast %211 : vector<1x16x224xf32> to vector<16x224xf32>
    %cst_128 = arith.constant dense<0.000000e+00> : vector<16x224xf32>
    %213 = tpu.matmul %204, %212, %cst_128 {dimension_numbers = #tpu.dot_dimension_numbers<[1], [0], [0], [1], [0, 0, 1, 1], [], []>} : vector<16x16xf32>, vector<16x224xf32>, vector<16x224xf32> -> vector<16x224xf32>
    %c3_129 = arith.constant 3 : index
    %c0_130 = arith.constant 0 : index
    %c0_131 = arith.constant 0 : index
    %214 = vector.load %arg9[%c3_129, %c0_130, %c0_131] : memref<4x16x224xf32, #tpu.memory_space<vmem>>, vector<1x16x224xf32>
    %215 = vector.shape_cast %214 : vector<1x16x224xf32> to vector<16x224xf32>
    %cst_132 = arith.constant dense<0.000000e+00> : vector<16x224xf32>
    %216 = tpu.matmul %204, %215, %cst_132 {dimension_numbers = #tpu.dot_dimension_numbers<[1], [0], [0], [1], [0, 0, 1, 1], [], []>} : vector<16x16xf32>, vector<16x224xf32>, vector<16x224xf32> -> vector<16x224xf32>
    %217 = tpu.concatenate %207, %210, %213, %216 in 0 : vector<16x224xf32>, vector<16x224xf32>, vector<16x224xf32>, vector<16x224xf32> -> vector<64x224xf32>
    %c1_133 = arith.constant 1 : index
    %218 = memref.load %arg11[%c1_133] : memref<2xf32, #tpu.memory_space<smem>>
    %c0_134 = arith.constant 0 : index
    %c0_135 = arith.constant 0 : index
    %219 = vector.load %arg10[%c0_134, %c0_135] : memref<112x64xf32, #tpu.memory_space<vmem>>, vector<56x64xf32>
    %cst_136 = arith.constant dense<0.000000e+00> : vector<56x224xf32>
    %220 = tpu.matmul %219, %217, %cst_136 {dimension_numbers = #tpu.dot_dimension_numbers<[1], [0], [0], [1], [0, 0, 1, 1], [], []>} : vector<56x64xf32>, vector<64x224xf32>, vector<56x224xf32> -> vector<56x224xf32>
    %221 = vector.broadcast %218 : f32 to vector<56x224xf32>
    %222 = arith.addf %220, %221 : vector<56x224xf32>
    %c0_137 = arith.constant 0 : index
    %c0_138 = arith.constant 0 : index
    %c0_139 = arith.constant 0 : index
    %223 = vector.load %arg12[%c0_137, %c0_138, %c0_139] : memref<1x112x224xf32, #tpu.memory_space<vmem>>, vector<1x56x224xf32>
    %224 = vector.shape_cast %223 : vector<1x56x224xf32> to vector<56x224xf32>
    %225 = vector.shape_cast %222 : vector<56x224xf32> to vector<1x56x224xf32>
    tpu.vector_store %arg12[%c0_137, %c0_138, %c0_139], %225 {strides = array<i32>} : memref<1x112x224xf32, #tpu.memory_space<vmem>>, vector<1x56x224xf32>,
    %c56 = arith.constant 56 : index
    %c0_140 = arith.constant 0 : index
    %226 = vector.load %arg10[%c56, %c0_140] : memref<112x64xf32, #tpu.memory_space<vmem>>, vector<56x64xf32>
    %cst_141 = arith.constant dense<0.000000e+00> : vector<56x224xf32>
    %227 = tpu.matmul %226, %217, %cst_141 {dimension_numbers = #tpu.dot_dimension_numbers<[1], [0], [0], [1], [0, 0, 1, 1], [], []>} : vector<56x64xf32>, vector<64x224xf32>, vector<56x224xf32> -> vector<56x224xf32>
    %228 = vector.broadcast %218 : f32 to vector<56x224xf32>
    %229 = arith.addf %227, %228 : vector<56x224xf32>
    %c0_142 = arith.constant 0 : index
    %c56_143 = arith.constant 56 : index
    %c0_144 = arith.constant 0 : index
    %230 = vector.load %arg12[%c0_142, %c56_143, %c0_144] : memref<1x112x224xf32, #tpu.memory_space<vmem>>, vector<1x56x224xf32>
    %231 = vector.shape_cast %230 : vector<1x56x224xf32> to vector<56x224xf32>
    %232 = vector.shape_cast %229 : vector<56x224xf32> to vector<1x56x224xf32>
    tpu.vector_store %arg12[%c0_142, %c56_143, %c0_144], %232 {strides = array<i32>} : memref<1x112x224xf32, #tpu.memory_space<vmem>>, vector<1x56x224xf32>,
    return
  }
  func.func @transform_0(%arg0: i32, %arg1: i32) -> (i32, i32, i32) {
    %c0_i32 = arith.constant 0 : i32
    %c0_i32_0 = arith.constant 0 : i32
    %c0_i32_1 = arith.constant 0 : i32
    return %arg0, %c0_i32, %c0_i32_0 : i32, i32, i32
  }
  func.func @transform_1(%arg0: i32, %arg1: i32) -> (i32, i32, i32) {
    %c0_i32 = arith.constant 0 : i32
    %c0_i32_0 = arith.constant 0 : i32
    %c0_i32_1 = arith.constant 0 : i32
    %c0_i32_2 = arith.constant 0 : i32
    return %c0_i32, %c0_i32_0, %c0_i32_1 : i32, i32, i32
  }
  func.func @transform_2(%arg0: i32, %arg1: i32) -> (i32, i32) {
    %c0_i32 = arith.constant 0 : i32
    %c0_i32_0 = arith.constant 0 : i32
    %c0_i32_1 = arith.constant 0 : i32
    return %c0_i32, %c0_i32_0 : i32, i32
  }
  func.func @transform_3(%arg0: i32, %arg1: i32) -> (i32, i32, i32) {
    %c0_i32 = arith.constant 0 : i32
    %c0_i32_0 = arith.constant 0 : i32
    %c0_i32_1 = arith.constant 0 : i32
    %c0_i32_2 = arith.constant 0 : i32
    return %c0_i32, %c0_i32_0, %c0_i32_1 : i32, i32, i32
  }
  func.func @transform_4(%arg0: i32, %arg1: i32) -> (i32, i32) {
    %c0_i32 = arith.constant 0 : i32
    %c0_i32_0 = arith.constant 0 : i32
    %c0_i32_1 = arith.constant 0 : i32
    return %c0_i32, %c0_i32_0 : i32, i32
  }
  func.func @transform_5(%arg0: i32, %arg1: i32) -> (i32, i32) {
    %c0_i32 = arith.constant 0 : i32
    %c0_i32_0 = arith.constant 0 : i32
    %c0_i32_1 = arith.constant 0 : i32
    return %c0_i32, %c0_i32_0 : i32, i32
  }
  func.func @transform_6(%arg0: i32, %arg1: i32) -> (i32, i32) {
    %c0_i32 = arith.constant 0 : i32
    %c0_i32_0 = arith.constant 0 : i32
    %c0_i32_1 = arith.constant 0 : i32
    return %c0_i32, %c0_i32_0 : i32, i32
  }
  func.func @transform_7(%arg0: i32, %arg1: i32) -> (i32, i32, i32) {
    %c0_i32 = arith.constant 0 : i32
    %c0_i32_0 = arith.constant 0 : i32
    %c0_i32_1 = arith.constant 0 : i32
    %c0_i32_2 = arith.constant 0 : i32
    return %c0_i32, %c0_i32_0, %c0_i32_1 : i32, i32, i32
  }
  func.func @transform_8(%arg0: i32, %arg1: i32) -> (i32, i32) {
    %c0_i32 = arith.constant 0 : i32
    %c0_i32_0 = arith.constant 0 : i32
    return %arg1, %c0_i32 : i32, i32
  }
  func.func @transform_9(%arg0: i32, %arg1: i32) -> i32 {
    %c0_i32 = arith.constant 0 : i32
    %c0_i32_0 = arith.constant 0 : i32
    return %c0_i32 : i32
  }
  func.func @transform_10(%arg0: i32, %arg1: i32) -> (i32, i32, i32) {
    %c0_i32 = arith.constant 0 : i32
    %c0_i32_0 = arith.constant 0 : i32
    return %arg0, %arg1, %c0_i32 : i32, i32, i32
  }
}

</mosaic_0001>

<bundles_post_ra>
// kernel: tpu_custom_call.1
= control target key start
LH: loop header
LB: loop body
LE: loop exit
PB: predicated region body
PF: predicated region fallthrough
CT: control target
= control target key end

     0   :  { %s4228_s0 = inlined_call_operand.vmem [shape: f32[2,32,256], index: 0, kind: input, shape index: {}]   ;;  %s4229_s1 = inlined_call_operand.vmem [shape: f32[9,16,32], index: 1, kind: input, shape index: {}]   ;;  %s4230_s2 = inlined_call_operand.vmem [shape: f32[16,1], index: 2, kind: input, shape index: {}]   ;;  %s4231_s3 = inlined_call_operand.vmem [shape: f32[9,8,16], index: 3, kind: input, shape index: {}]   ;;  %s4232_s4 = inlined_call_operand.vmem [shape: f32[8,1], index: 4, kind: input, shape index: {}]   ;;  %s4233_s5 = inlined_call_operand.hbm [shape: f32[8,8], index: 5, kind: input, shape index: {}]   ;;  %s4234_s6 = inlined_call_operand.vmem [shape: f32[9,256], index: 6, kind: input, shape index: {}]   ;;  %s4235_s7 = inlined_call_operand.hbm [shape: f32[4,16,224], index: 7, kind: input, shape index: {}]   ;;  %s4236_s8 = inlined_call_operand.vmem [shape: f32[224,64], index: 8, kind: input, shape index: {}]   ;;  %s4237_s9 = inlined_call_operand.vmem [shape: f32[2], index: 9, kind: input, shape index: {}]   ;;  %s4238_s10 = inlined_call_operand.hbm [shape: f32[2,224,224], index: 10, kind: output, shape index: {}]  }
   0x1   :  { %4246 = sst [smem:[#allocation22_spill]] %s4233_s5 }
   0x2   :  { %15 = vsyncpa [#allocation3], 0 }
   0x3   :  { %16 = vsyncpa [#allocation7], 0 }
   0x4   :  { %17 = vsyncpa [#allocation5], 0 }
   0x5   :  { %18 = vsyncpa [#allocation4], 0 }
   0x6   :  { %20 = vsyncpa [#allocation4 + $0x1], 0  ;;  %s3325_s13 = smov 0   ;;  %s3327_s14 = smov 0  }
   0x7   :  { %s3329_s15 = smov 0   ;;  %s3331_s16 = smov 0  }
   0x8   :  { %s3333_s17 = smov 0   ;;  %s3335_s18 = smov 0  }
   0x9   :  { %s3337_s19 = smov 0   ;;  %s3339_s20 = smov 0  }
   0xa LB: > { %4247 = sst [smem:[#allocation14_spill]] %s3220_s13  ;;  %s2552_s21 = sadd.s32 4294967295, %s3248_s20   ;;  %s3248_s20 = sphi %s3339_s20, %s26_s20   ;;  %s3244_s19 = sphi %s3337_s19, %s4268_s19   ;;  %s3240_s18 = sphi %s3335_s18, %s4267_s18   ;;  %s3236_s17 = sphi %s3333_s17, %s4266_s17   ;;  %s3232_s16 = sphi %s3331_s16, %s4265_s16   ;;  %s3228_s15 = sphi %s3329_s15, %s4264_s15   ;;  %s3224_s14 = sphi %s3327_s14, %s4270_s14   ;;  %s3220_s13 = sphi %s3325_s13, %s4269_s13  }
   0xb   : > { %4248 = sst [smem:[#allocation15_spill]] %s3228_s15  ;;  %s2553_s22 = sadd.s32 4294967294, %s3248_s20  }
   0xc   : > { %4249 = sst [smem:[#allocation16_spill]] %s3240_s18  ;;  %s35_s23 = sadd.s32 1, %s3240_s18 }
   0xd   : > { %4250 = sst [smem:[#allocation17_spill]] %s3244_s19  ;;  %s38_s24 = sadd.s32 1, %s3244_s19 }
   0xe   : > { %p36_p0 = scmp.ge.s32.totalorder %s35_s23, 2  ;;  %s267_s25 = sadd.s32 1, %s3228_s15 }
   0xf   : > { %p277_p1 = scmp.ne.s32.totalorder %s3228_s15, %s3224_s14  ;;  %p278_p2 = scmp.eq.s32.totalorder %s2552_s21, 3 }
  0x10   : > { %s4272_s23 = smov (%p36_p0, %s35_s23), 0  ;;  %s4274_s24 = smov (!%p36_p0, %s38_s24), %s3244_s19 }
  0x11   : > { %4251 = sst [smem:[#allocation18_spill]] %s4272_s23  ;;  %s263_s26 = ssub.s32 %s3240_s18, %s4272_s23 }
  0x12   : > { %p3377_p3 = por %p278_p2, %p277_p1  ;;  %p40_p4 = scmp.ge.s32.totalorder %s4274_s24, 2 }
  0x13   : > { %p283_p5 = scmp.ne.s32.totalorder %s3224_s14, %s3220_s13  ;;  %p284_p6 = scmp.eq.s32.totalorder %s2553_s22, 3 }
  0x14   : > { %p2554_p7 = scmp.ge.s32.totalorder %s3248_s20, 1  ;;  %s4276_s24 = smov (%p40_p4, %s4274_s24), 0 }
  0x15   : > { %4253 = sst [smem:[#allocation19_spill]] %s4276_s24  ;;  %p3386_p8 = por %p284_p6, %p283_p5 }
  0x16   : > { %p291_p9 = scmp.lt.s32.totalorder %s3248_s20, 5  ;;  %s262_s29 = ssub.s32 %s3244_s19, %s4276_s24 }
  0x17   : > { %s4254_s28 = scalar_select %p3386_p8, 1, 0 }
  0x18   : > { %s264_s30 = sor.u32 %s263_s26, %s262_s29  ;;  %p3393_p10 = pnand %p2554_p7, %p291_p9 }
  0x19   : > { %4255 = sst [smem:[#allocation20_spill]] %s4254_s28  ;;  %p265_p11 = scmp.eq.s32.totalorder %s264_s30, 0 }
  0x1a   : > { %p3397_p12 = scmp.eq.s32.totalorder %s2552_s21, 0  ;;  %p2720_p13 = pneg %p3393_p10 }
  0x1b   : > { %s4258_s5 = sld [smem:[#allocation22_spill]]  ;;  %s3250_s26 = smov [#allocation2]  }
  0x1c   : > { %s3407_s28 = scalar_select %p265_p11, %s3228_s15, %s267_s25  }
  0x1d   : > { %s317_s29 = sshll.u32 %s3250_s26, 4  ;;  %p3411_p0 = pnand %p3397_p12, %p2720_p13  ;;  %s318_s29 = int_to_ptr.vmem [resolvable:$true] %s317_s29 }
  0x1e   : > { %4259 = sst [smem:[#allocation21_spill]] %s3407_s28  ;;  %s329_s19 = sshll.u32 %s4235_s7, 4  ;;  %s330_s19 = int_to_ptr.hbm [resolvable:$true] %s329_s19 }
  0x1f   : > { %s3251_s23 = smov [#allocation6]   ;;  %s3252_s28 = smov 256  }
  0x20   : > { %s331_s25 = sshll.u32 %s3251_s23, 4  ;;  %s3253_s15 = smov 16   ;;  %s332_s25 = int_to_ptr.vmem [resolvable:$true] %s331_s25 }
  0x21   : > { %s315_s18 = sshll.u32 %s4258_s5, 4  ;;  %s344_s5 = sshll.u32 %s4237_s9, 4  ;;  %s316_s18 = int_to_ptr.hbm [resolvable:$true] %s315_s18  ;;  %s345_s5 = int_to_ptr.vmem [resolvable:$true] %s344_s5 }
  0x22   : > { %2723 = dma.hbm_to_vmem [thread:$0]  (!%p3411_p0), %s316_s18, 128, %s318_s29, [#allocation3]  }
  0x23   : > { %2726 = dma.hbm_to_vmem [thread:$0]  (!%p3411_p0), %s330_s19, 2048, %s332_s25, [#allocation7], %s3252_s28, %s3252_s28, %s3253_s15  }
  0x24   : > { %s3254_s13 = smov [#allocation8]   ;;  %374 = sbr.rel (%p3393_p10) target bundleno = 1338 (0x53a), region = 60 }
  0x25   : > { %2729 = dma.vmem_to_smem (!%p3411_p0), %s345_s5, 16, %s3254_s13, [#allocation5]  }
  0x29   : > { %3203 = dma.done.wait (%p3397_p12), [#allocation3], 128  }
  0x2a   : > { %3205 = vsyncadd (%p3397_p12), [#allocation3], 4294967168 }
  0x2b   : > { %3207 = dma.done.wait (%p3397_p12), [#allocation7], 2048  }
  0x2c   : > { %3209 = vsyncadd (%p3397_p12), [#allocation7], 4294965248 }
  0x2d   : > { %3211 = dma.done.wait (%p3397_p12), [#allocation5], 16  }
  0x2e   : > { %3213 = vsyncadd (%p3397_p12), [#allocation5], 4294967280 }
  0x2f   : > { %391 = sfence }
  0x30   : > { %p429_p1 = scmp.lt.s32.totalorder %s3236_s17, 1  ;;  %s3255_s24 = smov 17   ;;  %v465_v12 = vlaneseq  ;;  %v476_v47 = vld [vmem:[%s4229_s1] sm:$0xff]  ;;  %vm478_vm3 = vcmask 261120   ;;  %v2570_v62 = vld [vmem:[%s4229_s1 + $0x10] sm:$0xff]  ;;  %v477_v63 = vld [vmem:[%s4229_s1 + $0x8] sm:$0xff] }
  0x31   : > { %s3256_s28 = smov 16   ;;  %s3257_s11 = smov 15   ;;  %vm1302_vm9 = vcmask 130048   ;;  %vm1835_vm10 = vcmask 64512   ;;  %vm1941_vm11 = vcmask 1040384   ;;  %vm1943_vm12 = vcmask 1041408  }
  0x32   : > { %s430_s5 = scalar_select %p429_p1, %s3236_s17, 1  ;;  %v3502_v13 = vand.u32 127, %v465_v12  ;;  %vm1945_vm13 = vcmask 1042432   ;;  %vm1947_vm14 = vcmask 1043456   ;;  %vm1949_vm15 = vcmask 1044480  }
  0x33   : > { %s3258_s12 = smov 1   ;;  %s3259_s29 = smov 127  }
  0x34   : > { %s2702_s13 = sshll.u32 %s430_s5, 6  ;;  %s3260_s21 = smov 113   ;;  %vm561_vm0 = vcmp.lt.s32.totalorder %v3502_v13, 16  ;;  %vm467_vm1 = vcmp.lt.s32.totalorder %v3502_v13, 17  ;;  %vm656_vm2 = vcmp.lt.s32.totalorder %v3502_v13, 15  ;;  %vm751_vm4 = vcmp.lt.s32.totalorder %v3502_v13, 1 }
  0x35   : > { %s433_s19 = scalar_lea.vmem %s4228_s0, %s2702_s13  ;;  %s3261_s30 = smov 112   ;;  %vm1000_vm5 = vcmp.lt.s32.totalorder %v3502_v13, 113  ;;  %vm905_vm6 = vcmp.lt.s32.totalorder %v3502_v13, 127  ;;  %vm1095_vm7 = vcmp.lt.s32.totalorder %v3502_v13, 112  ;;  %vm1190_vm8 = vcmp.lt.s32.totalorder %v3502_v13, 111 }
  0x36   : > { %v3446_v0 = vld [vmem:[%s433_s19 + $0x30] sm:$0xff]  ;;  %v3448_v1 = vld [vmem:[%s433_s19 + $0x38] sm:$0xff]  ;;  %v3461_v6 = vld [vmem:[%s433_s19 + $0x20] sm:$0xff]  ;;  %s3262_s23 = smov 111   ;;  %s3264_s22 = smov 80  }
  0x37   : > { %v3450_v2 = vld [vmem:[%s433_s19 + $0x10] sm:$0xff]  ;;  %v2825_v3 = vpack.i.bf16 %v3448_v1, %v3446_v0  ;;  %v3454_v4 = vld [vmem:[%s433_s19 + $0x18] sm:$0xff]  ;;  %v3463_v7 = vld [vmem:[%s433_s19 + $0x28] sm:$0xff]  ;;  %s3265_s26 = smov 96   ;;  %s3266_s5 = smov 32  }
  0x38   : > { %v2835_v5 = vpack.i.bf16 %v3454_v4, %v3450_v2  ;;  %v3465_v8 = vld [vmem:[%s433_s19] sm:$0xff]  ;;  %v3467_v9 = vld [vmem:[%s433_s19 + $0x8] sm:$0xff]  ;;  %v2830_v10 = vpack.i.bf16 %v3463_v7, %v3461_v6  ;;  %s3267_s13 = smov 48   ;;  %s3268_s15 = smov 64  }
  0x39   : > { %2826 = vrot.lane.b32.xlu0 %v2825_v3, %s3255_s24  ;;  %2846 = vrot.lane.b32.xlu2 %v2825_v3, %s3256_s28  ;;  %v2840_v11 = vpack.i.bf16 %v3467_v9, %v3465_v8 }
  0x3a   : > { %2836 = vrot.lane.b32.xlu1 %v2835_v5, %s3255_s24 }
  0x41   : > { %2831 = vrot.lane.b32.xlu0 %v2830_v10, %s3255_s24  ;;  %2851 = vrot.lane.b32.xlu2 %v2830_v10, %s3256_s28 }
  0x42   : > { %2841 = vrot.lane.b32.xlu1 %v2840_v11, %s3255_s24 }
  0x49   : > { %2856 = vrot.lane.b32.xlu0 %v2835_v5, %s3256_s28  ;;  %2866 = vrot.lane.b32.xlu2 %v2825_v3, %s3257_s11 }
  0x4a   : > { %2861 = vrot.lane.b32.xlu1 %v2840_v11, %s3256_s28 }
  0x51   : > { %2871 = vrot.lane.b32.xlu0 %v2830_v10, %s3257_s11  ;;  %2881 = vrot.lane.b32.xlu2 %v2840_v11, %s3257_s11 }
  0x52   : > { %2876 = vrot.lane.b32.xlu1 %v2835_v5, %s3257_s11 }
  0x59   : > { %2886 = vrot.lane.b32.xlu0 %v2825_v3, %s3258_s12  ;;  %2896 = vrot.lane.b32.xlu2 %v2835_v5, %s3258_s12 }
  0x5a   : > { %2891 = vrot.lane.b32.xlu1 %v2830_v10, %s3258_s12 }
  0x61   : > { %2901 = vrot.lane.b32.xlu0 %v2840_v11, %s3258_s12  ;;  %2911 = vrot.lane.b32.xlu2 %v2830_v10, %s3259_s29 }
  0x62   : > { %2906 = vrot.lane.b32.xlu1 %v2825_v3, %s3259_s29 }
  0x69   : > { %2916 = vrot.lane.b32.xlu0 %v2835_v5, %s3259_s29  ;;  %2926 = vrot.lane.b32.xlu2 %v2825_v3, %s3260_s21 }
  0x6a   : > { %2921 = vrot.lane.b32.xlu1 %v2840_v11, %s3259_s29 }
  0x71   : > { %2931 = vrot.lane.b32.xlu0 %v2830_v10, %s3260_s21  ;;  %2941 = vrot.lane.b32.xlu2 %v2840_v11, %s3260_s21 }
  0x72   : > { %2936 = vrot.lane.b32.xlu1 %v2835_v5, %s3260_s21 }
  0x79   : > { %2946 = vrot.lane.b32.xlu0 %v2825_v3, %s3261_s30  ;;  %2956 = vrot.lane.b32.xlu2 %v2835_v5, %s3261_s30 }
  0x7a   : > { %2951 = vrot.lane.b32.xlu1 %v2830_v10, %s3261_s30 }
  0x81   : > { %2961 = vrot.lane.b32.xlu0 %v2840_v11, %s3261_s30  ;;  %2971 = vrot.lane.b32.xlu2 %v2830_v10, %s3262_s23 }
  0x82   : > { %2966 = vrot.lane.b32.xlu1 %v2825_v3, %s3262_s23 }
  0x89   : > { %2976 = vrot.lane.b32.xlu0 %v2835_v5, %s3262_s23 }
  0x8a   : > { %2981 = vrot.lane.b32.xlu1 %v2840_v11, %s3262_s23 }
  0x93   : > { %v2847_v14 = vpop.permute.xlu2 %2846 }
  0x94   : > { %v2849_v15 = vunpack.i.h.bf16 %v2847_v14  ;;  %v2848_v16 = vunpack.i.l.bf16 %v2847_v14 }
  0x96   : > { %v569_v17 = vsel %vm561_vm0, %v2849_v15, %v2848_v16  ;;  %v565_v18 = vsel %vm561_vm0, %v2848_v16, %v2849_v15 }
  0x97   : > { %591 = vmatpush.msra.mxu2 %v569_v17  ;;  %614 = vmatpush.msra.mxu3 %v565_v18 }
  0x9b   : > { %v2852_v19 = vpop.permute.xlu2 %2851 }
  0x9c   : > { %v2854_v20 = vunpack.i.h.bf16 %v2852_v19  ;;  %v2853_v21 = vunpack.i.l.bf16 %v2852_v19 }
  0x9e   : > { %v568_v22 = vsel %vm561_vm0, %v2854_v20, %v2853_v21  ;;  %v564_v23 = vsel %vm561_vm0, %v2853_v21, %v2854_v20 }
  0x9f   : > { %592 = vmatpush.msra.mxu2 %v568_v22  ;;  %615 = vmatpush.msra.mxu3 %v564_v23  ;;  %v2571_v22 = vld [vmem:[%s4229_s1 + $0x18] sm:$0xff] }
  0xa3   : > { %v2867_v24 = vpop.permute.xlu2 %2866 }
  0xa4   : > { %v2869_v38 = vunpack.i.h.bf16 %v2867_v24  ;;  %v2868_v39 = vunpack.i.l.bf16 %v2867_v24 }
  0xa6   : > { %v664_v50 = vsel %vm656_vm2, %v2869_v38, %v2868_v39  ;;  %v660_v51 = vsel %vm656_vm2, %v2868_v39, %v2869_v38 }
  0xab   : > { %v2827_v25 = vpop.permute.xlu0 %2826  ;;  %v3518_v31 = vpop.permute.xlu2 %2881 }
  0xac   : > { %v2829_v26 = vunpack.i.h.bf16 %v2827_v25  ;;  %v2828_v27 = vunpack.i.l.bf16 %v2827_v25  ;;  %v2837_v28 = vpop.permute.xlu1 %2836  ;;  %v2884_v14 = vunpack.i.h.bf16 %v3518_v31  ;;  %v2883_v15 = vunpack.i.l.bf16 %v3518_v31  ;;  %v2577_v25 = vld [vmem:[%s4229_s1 + $0x20] sm:$0xff] }
  0xad   : > { %v2839_v33 = vunpack.i.h.bf16 %v2837_v28  ;;  %v2838_v34 = vunpack.i.l.bf16 %v2837_v28 }
  0xae   : > { %v475_v29 = vsel %vm467_vm1, %v2829_v26, %v2828_v27  ;;  %v471_v30 = vsel %vm467_vm1, %v2828_v27, %v2829_v26  ;;  %v661_v23 = vsel %vm656_vm2, %v2884_v14, %v2883_v15  ;;  %v657_v24 = vsel %vm656_vm2, %v2883_v15, %v2884_v14 }
  0xaf   : > { %497 = vmatpush.msra.mxu0 %v475_v29  ;;  %520 = vmatpush.msra.mxu1 %v471_v30  ;;  %v473_v44 = vsel %vm467_vm1, %v2839_v33, %v2838_v34  ;;  %v469_v45 = vsel %vm467_vm1, %v2838_v34, %v2839_v33 }
  0xb3   : > { %v2832_v32 = vpop.permute.xlu0 %2831  ;;  %v3529_v46 = vpop.permute.xlu2 %2896 }
  0xb4   : > { %v2834_v35 = vunpack.i.h.bf16 %v2832_v32  ;;  %v2833_v36 = vunpack.i.l.bf16 %v2832_v32  ;;  %v2842_v37 = vpop.permute.xlu1 %2841  ;;  %v2899_v30 = vunpack.i.h.bf16 %v3529_v46  ;;  %v2898_v31 = vunpack.i.l.bf16 %v3529_v46 }
  0xb5   : > { %v2844_v40 = vunpack.i.h.bf16 %v2842_v37  ;;  %v2843_v41 = vunpack.i.l.bf16 %v2842_v37 }
  0xb6   : > { %v474_v42 = vsel %vm467_vm1, %v2834_v35, %v2833_v36  ;;  %v470_v43 = vsel %vm467_vm1, %v2833_v36, %v2834_v35 }
  0xb7   : > { %498 = vmatpush.msra.mxu0 %v474_v42  ;;  %521 = vmatpush.msra.mxu1 %v470_v43  ;;  %v472_v48 = vsel %vm467_vm1, %v2844_v40, %v2843_v41  ;;  %v468_v49 = vsel %vm467_vm1, %v2843_v41, %v2844_v40  ;;  %v2578_v41 = vld [vmem:[%s4229_s1 + $0x28] sm:$0xff] }
  0xb9   : > { %499 = vmatpush.msra.mxu0 %v473_v44  ;;  %522 = vmatpush.msra.mxu1 %v469_v45 }
  0xbb   : > { %v2857_v52 = vpop.permute.xlu0 %2856  ;;  %500 = vmatpush.msra.mxu0 %v472_v48  ;;  %523 = vmatpush.msra.mxu1 %v468_v49  ;;  %v3560_v3 = vpop.permute.xlu2 %2911  ;;  %v2584_v48 = vld [vmem:[%s4229_s1 + $0x30] sm:$0xff] }
  0xbc   : > { %v2859_v53 = vunpack.i.h.bf16 %v2857_v52  ;;  %v2858_v54 = vunpack.i.l.bf16 %v2857_v52  ;;  %2566 = vmatmul.msk.f32.vlgmr.msra.gmra.mxu0 %vm478_vm3, %v476_v47  ;;  %2568 = vmatmul.msk.f32.vlgmr.msra.gmra.mxu1 %vm478_vm3, %v476_v47  ;;  %v2862_v55 = vpop.permute.xlu1 %2861  ;;  %v2913_v45 = vunpack.i.l.bf16 %v3560_v3 }
  0xbd   : > { %v2864_v56 = vunpack.i.h.bf16 %v2862_v55  ;;  %v2863_v57 = vunpack.i.l.bf16 %v2862_v55  ;;  %686 = vmatpush.msrb.mxu0 %v664_v50  ;;  %709 = vmatpush.msrb.mxu1 %v660_v51 }
  0xbe   : > { %v567_v58 = vsel %vm561_vm0, %v2859_v53, %v2858_v54  ;;  %v563_v59 = vsel %vm561_vm0, %v2858_v54, %v2859_v53  ;;  %v2591_v53 = vld [vmem:[%s4229_s1 + $0x40] sm:$0xff] }
  0xbf   : > { %593 = vmatpush.msra.mxu2 %v567_v58  ;;  %616 = vmatpush.msra.mxu3 %v563_v59  ;;  %v566_v60 = vsel %vm561_vm0, %v2864_v56, %v2863_v57  ;;  %v562_v61 = vsel %vm561_vm0, %v2863_v57, %v2864_v56 }
  0xc1   : > { %594 = vmatpush.msra.mxu2 %v566_v60  ;;  %617 = vmatpush.msra.mxu3 %v562_v61  ;;  %v2585_v60 = vld [vmem:[%s4229_s1 + $0x38] sm:$0xff] }
  0xc2   : > { %2572 = vmatmul.msk.f32.vlgmr.msra.gmra.mxu2 %vm478_vm3, %v2570_v62  ;;  %2574 = vmatmul.msk.f32.vlgmr.msra.gmra.mxu3 %vm478_vm3, %v2570_v62 }
  0xc3   : > { %v2872_v5 = vpop.permute.xlu0 %2871  ;;  %v2927_v32 = vpop.permute.xlu2 %2926 }
  0xc4   : > { %v2874_v10 = vunpack.i.h.bf16 %v2872_v5  ;;  %v2873_v11 = vunpack.i.l.bf16 %v2872_v5  ;;  %2567 = vmatmul.msk.f32.gmra.mxu0 %vm478_vm3, %v477_v63  ;;  %2569 = vmatmul.msk.f32.gmra.mxu1 %vm478_vm3, %v477_v63  ;;  %v2877_v12 = vpop.permute.xlu1 %2876  ;;  %v2929_v39 = vunpack.i.h.bf16 %v2927_v32  ;;  %v2928_v40 = vunpack.i.l.bf16 %v2927_v32 }
  0xc5   : > { %v2879_v16 = vunpack.i.h.bf16 %v2877_v12  ;;  %v2878_v17 = vunpack.i.l.bf16 %v2877_v12 }
  0xc6   : > { %v663_v18 = vsel %vm656_vm2, %v2874_v10, %v2873_v11  ;;  %v659_v19 = vsel %vm656_vm2, %v2873_v11, %v2874_v10  ;;  %v2592_v10 = vld [vmem:[%s4229_s1 + $0x48] sm:$0xff] }
  0xc7   : > { %687 = vmatpush.msrb.mxu0 %v663_v18  ;;  %710 = vmatpush.msrb.mxu1 %v659_v19  ;;  %v662_v20 = vsel %vm656_vm2, %v2879_v16, %v2878_v17  ;;  %v658_v21 = vsel %vm656_vm2, %v2878_v17, %v2879_v16 }
  0xc9   : > { %688 = vmatpush.msrb.mxu0 %v662_v20  ;;  %711 = vmatpush.msrb.mxu1 %v658_v21  ;;  %v2597_v20 = vld [vmem:[%s4229_s1 + $0x50] sm:$0xff] }
  0xca   : > { %2573 = vmatmul.msk.f32.gmra.mxu2 %vm478_vm3, %v2571_v22  ;;  %2575 = vmatmul.msk.f32.gmra.mxu3 %vm478_vm3, %v2571_v22 }
  0xcb   : > { %v2887_v26 = vpop.permute.xlu0 %2886  ;;  %689 = vmatpush.msrb.mxu0 %v661_v23  ;;  %712 = vmatpush.msrb.mxu1 %v657_v24  ;;  %v2942_v61 = vpop.permute.xlu2 %2941 }
  0xcc   : > { %v2889_v27 = vunpack.i.h.bf16 %v2887_v26  ;;  %v2888_v28 = vunpack.i.l.bf16 %v2887_v26  ;;  %2579 = vmatmul.msk.f32.vlgmr.msrb.gmra.mxu0 %vm478_vm3, %v2577_v25  ;;  %2581 = vmatmul.msk.f32.vlgmr.msrb.gmra.mxu1 %vm478_vm3, %v2577_v25  ;;  %v2892_v29 = vpop.permute.xlu1 %2891  ;;  %v2944_v16 = vunpack.i.h.bf16 %v2942_v61  ;;  %v2943_v17 = vunpack.i.l.bf16 %v2942_v61 }
  0xcd   : > { %v2894_v33 = vunpack.i.h.bf16 %v2892_v29  ;;  %v2893_v34 = vunpack.i.l.bf16 %v2892_v29  ;;  %851 = vmatpush.msra.mxu0 %v3446_v0  ;;  %874 = vmatpush.msra.mxu1 %v3448_v1  ;;  %v757_v0 = vsel %vm751_vm4, %v2899_v30, %v2898_v31  ;;  %v753_v1 = vsel %vm751_vm4, %v2898_v31, %v2899_v30  ;;  %v1269_v30 = vld [vmem:[%s4230_s2] sm:$0xff]  ;;  %v1270_v31 = vld [vmem:[%s4230_s2 + $0x8] sm:$0xff] }
  0xce   : > { %v759_v35 = vsel %vm751_vm4, %v2889_v27, %v2888_v28  ;;  %v755_v36 = vsel %vm751_vm4, %v2888_v28, %v2889_v27  ;;  %v1001_v26 = vsel %vm1000_vm5, %v2943_v17, %v2944_v16  ;;  %v1005_v27 = vsel %vm1000_vm5, %v2944_v16, %v2943_v17  ;;  %v2604_v28 = vld [vmem:[%s4229_s1 + $0x60] sm:$0xff] }
  0xcf   : > { %781 = vmatpush.msrb.mxu2 %v759_v35  ;;  %804 = vmatpush.msrb.mxu3 %v755_v36  ;;  %v758_v37 = vsel %vm751_vm4, %v2894_v33, %v2893_v34  ;;  %v754_v38 = vsel %vm751_vm4, %v2893_v34, %v2894_v33 }
  0xd0   : > { %852 = vmatpush.msra.mxu0 %v3461_v6  ;;  %875 = vmatpush.msra.mxu1 %v3463_v7  ;;  %v1004_v6 = vsel %vm1000_vm5, %v2928_v40, %v2929_v39  ;;  %v1008_v7 = vsel %vm1000_vm5, %v2929_v39, %v2928_v40  ;;  %v2598_v39 = vld [vmem:[%s4229_s1 + $0x58] sm:$0xff]  ;;  %v3263_v40 = vmov 0  }
  0xd1   : > { %782 = vmatpush.msrb.mxu2 %v758_v37  ;;  %805 = vmatpush.msrb.mxu3 %v754_v38 }
  0xd2   : > { %853 = vmatpush.msra.mxu0 %v3450_v2  ;;  %876 = vmatpush.msra.mxu1 %v3454_v4  ;;  %v2914_v4 = vunpack.i.h.bf16 %v3560_v3 }
  0xd3   : > { %v2902_v42 = vpop.permute.xlu0 %2901  ;;  %783 = vmatpush.msrb.mxu2 %v757_v0  ;;  %806 = vmatpush.msrb.mxu3 %v753_v1  ;;  %v2957_v25 = vpop.permute.xlu2 %2956 }
  0xd4   : > { %v2904_v43 = vunpack.i.h.bf16 %v2902_v42  ;;  %v2903_v44 = vunpack.i.l.bf16 %v2902_v42  ;;  %2580 = vmatmul.msk.f32.gmra.mxu0 %vm478_vm3, %v2578_v41  ;;  %2582 = vmatmul.msk.f32.gmra.mxu1 %vm478_vm3, %v2578_v41  ;;  %v2907_v2 = vpop.permute.xlu1 %2906  ;;  %v2959_v35 = vunpack.i.h.bf16 %v2957_v25  ;;  %v2958_v36 = vunpack.i.l.bf16 %v2957_v25 }
  0xd5   : > { %v2909_v46 = vunpack.i.h.bf16 %v2907_v2  ;;  %v2908_v47 = vunpack.i.l.bf16 %v2907_v2  ;;  %854 = vmatpush.msra.mxu0 %v3465_v8  ;;  %877 = vmatpush.msra.mxu1 %v3467_v9  ;;  %v908_v8 = vsel %vm905_vm6, %v2913_v45, %v2914_v4  ;;  %v912_v9 = vsel %vm905_vm6, %v2914_v4, %v2913_v45 }
  0xd6   : > { %v756_v49 = vsel %vm751_vm4, %v2904_v43, %v2903_v44  ;;  %v752_v50 = vsel %vm751_vm4, %v2903_v44, %v2904_v43  ;;  %2986 = vset.pattern.permute.xlu0 %v3263_v40  ;;  %2985 = vset.pattern.permute.xlu2 %v3263_v40  ;;  %v2605_v43 = vld [vmem:[%s4229_s1 + $0x68] sm:$0xff] }
  0xd7   : > { %1030 = vmatpush.msrb.mxu0 %v1004_v6  ;;  %1053 = vmatpush.msrb.mxu1 %v1008_v7  ;;  %v909_v51 = vsel %vm905_vm6, %v2908_v47, %v2909_v46  ;;  %v913_v52 = vsel %vm905_vm6, %v2909_v46, %v2908_v47  ;;  %v1097_v6 = vsel %vm1095_vm7, %v2958_v36, %v2959_v35 }
  0xd8   : > { %784 = vmatpush.msrb.mxu2 %v756_v49  ;;  %807 = vmatpush.msrb.mxu3 %v752_v50  ;;  %v1101_v7 = vsel %vm1095_vm7, %v2959_v35, %v2958_v36  ;;  %v531_v35 = vld [vmem:[%s4234_s6] ss:$8 sm:$0x3]  ;;  %v2583_v36 = vld [vmem:[%s4234_s6 + $0x2] ss:$8 sm:$0x3] }
  0xd9   : > { %2586 = vmatmul.msk.f32.vlgmr.msrb.gmra.mxu2 %vm478_vm3, %v2584_v48  ;;  %2588 = vmatmul.msk.f32.vlgmr.msrb.gmra.mxu3 %vm478_vm3, %v2584_v48  ;;  %v3776_v40 = vperm.slane %v531_v35, 0 }
  0xda   : > { %935 = vmatpush.msra.mxu2 %v909_v51  ;;  %958 = vmatpush.msra.mxu3 %v913_v52  ;;  %v2611_v51 = vld [vmem:[%s4229_s1 + $0x70] sm:$0xff] }
  0xdb   : > { %v2917_v54 = vpop.permute.xlu0 %2916  ;;  %1273 = vperm.xlu0 %2986, %v1269_v30   ;;  %1278 = vperm.xlu2 %2985, %v1270_v31   ;;  %v2972_v44 = vpop.permute.xlu2 %2971 }
  0xdc   : > { %936 = vmatpush.msra.mxu2 %v908_v8  ;;  %959 = vmatpush.msra.mxu3 %v912_v9  ;;  %v2919_v55 = vunpack.i.h.bf16 %v2917_v54  ;;  %v2918_v56 = vunpack.i.l.bf16 %v2917_v54  ;;  %v2922_v57 = vpop.permute.xlu1 %2921  ;;  %v2974_v47 = vunpack.i.h.bf16 %v2972_v44  ;;  %v2973_v48 = vunpack.i.l.bf16 %v2972_v44 }
  0xdd   : > { %2593 = vmatmul.msk.f32.vlgmr.msra.gmra.mxu0 %vm478_vm3, %v2591_v53  ;;  %2595 = vmatmul.msk.f32.vlgmr.msra.gmra.mxu1 %vm478_vm3, %v2591_v53  ;;  %v2924_v58 = vunpack.i.h.bf16 %v2922_v57  ;;  %v2923_v59 = vunpack.i.l.bf16 %v2922_v57 }
  0xde   : > { %v907_v62 = vsel %vm905_vm6, %v2918_v56, %v2919_v55  ;;  %v911_v63 = vsel %vm905_vm6, %v2919_v55, %v2918_v56  ;;  %v1193_v54 = vsel %vm1190_vm8, %v2973_v48, %v2974_v47  ;;  %v1197_v55 = vsel %vm1190_vm8, %v2974_v47, %v2973_v48 }
  0xdf   : > { %937 = vmatpush.msra.mxu2 %v907_v62  ;;  %960 = vmatpush.msra.mxu3 %v911_v63  ;;  %v906_v3 = vsel %vm905_vm6, %v2923_v59, %v2924_v58  ;;  %v910_v5 = vsel %vm905_vm6, %v2924_v58, %v2923_v59  ;;  %v2612_v62 = vld [vmem:[%s4229_s1 + $0x78] sm:$0xff] }
  0xe1   : > { %2587 = vmatmul.msk.f32.gmra.mxu2 %vm478_vm3, %v2585_v60  ;;  %2589 = vmatmul.msk.f32.gmra.mxu3 %vm478_vm3, %v2585_v60 }
  0xe2   : > { %938 = vmatpush.msra.mxu2 %v906_v3  ;;  %961 = vmatpush.msra.mxu3 %v910_v5 }
  0xe3   : > { %v2932_v11 = vpop.permute.xlu0 %2931 }
  0xe4   : > { %v2934_v12 = vunpack.i.h.bf16 %v2932_v11  ;;  %v2933_v14 = vunpack.i.l.bf16 %v2932_v11  ;;  %v2937_v15 = vpop.permute.xlu1 %2936  ;;  %v2618_v11 = vld [vmem:[%s4229_s1 + $0x80] sm:$0xff] }
  0xe5   : > { %2594 = vmatmul.msk.f32.gmra.mxu0 %vm478_vm3, %v2592_v10  ;;  %2596 = vmatmul.msk.f32.gmra.mxu1 %vm478_vm3, %v2592_v10  ;;  %v2939_v18 = vunpack.i.h.bf16 %v2937_v15  ;;  %v2938_v19 = vunpack.i.l.bf16 %v2937_v15 }
  0xe6   : > { %v1003_v21 = vsel %vm1000_vm5, %v2933_v14, %v2934_v12  ;;  %v1007_v22 = vsel %vm1000_vm5, %v2934_v12, %v2933_v14  ;;  %v2619_v12 = vld [vmem:[%s4229_s1 + $0x88] sm:$0xff] }
  0xe7   : > { %1031 = vmatpush.msrb.mxu0 %v1003_v21  ;;  %1054 = vmatpush.msrb.mxu1 %v1007_v22  ;;  %v1002_v23 = vsel %vm1000_vm5, %v2938_v19, %v2939_v18  ;;  %v1006_v24 = vsel %vm1000_vm5, %v2939_v18, %v2938_v19 }
  0xe9   : > { %2599 = vmatmul.msk.f32.vlgmr.msra.gmra.mxu2 %vm478_vm3, %v2597_v20  ;;  %2601 = vmatmul.msk.f32.vlgmr.msra.gmra.mxu3 %vm478_vm3, %v2597_v20 }
  0xea   : > { %1032 = vmatpush.msrb.mxu0 %v1002_v23  ;;  %1055 = vmatpush.msrb.mxu1 %v1006_v24 }
  0xeb   : > { %v2947_v29 = vpop.permute.xlu0 %2946 }
  0xec   : > { %1033 = vmatpush.msrb.mxu0 %v1001_v26  ;;  %1056 = vmatpush.msrb.mxu1 %v1005_v27  ;;  %v2949_v32 = vunpack.i.h.bf16 %v2947_v29  ;;  %v2948_v33 = vunpack.i.l.bf16 %v2947_v29  ;;  %v2952_v34 = vpop.permute.xlu1 %2951 }
  0xed   : > { %2606 = vmatmul.msk.f32.vlgmr.msrb.gmra.mxu0 %vm478_vm3, %v2604_v28  ;;  %2608 = vmatmul.msk.f32.vlgmr.msrb.gmra.mxu1 %vm478_vm3, %v2604_v28  ;;  %v2954_v37 = vunpack.i.h.bf16 %v2952_v34  ;;  %v2953_v38 = vunpack.i.l.bf16 %v2952_v34  ;;  %v2576_v34 = vld [vmem:[%s4234_s6 + $0x1] ss:$8 sm:$0x3] }
  0xee   : > { %v1099_v0 = vsel %vm1095_vm7, %v2948_v33, %v2949_v32  ;;  %v1103_v1 = vsel %vm1095_vm7, %v2949_v32, %v2948_v33 }
  0xef   : > { %1125 = vmatpush.msrb.mxu2 %v1099_v0  ;;  %1148 = vmatpush.msrb.mxu3 %v1103_v1  ;;  %v1098_v41 = vsel %vm1095_vm7, %v2953_v38, %v2954_v37  ;;  %v1102_v42 = vsel %vm1095_vm7, %v2954_v37, %v2953_v38  ;;  %v3769_v37 = vperm.slane %v2576_v34, 0  ;;  %v3771_v38 = vperm.slane %v2576_v34, 1 }
  0xf0   : > { %v3778_v0 = vperm.slane %v531_v35, 1  ;;  %v3780_v1 = vperm.slane %v2583_v36, 0 }
  0xf1   : > { %2600 = vmatmul.msk.f32.gmra.mxu2 %vm478_vm3, %v2598_v39  ;;  %2602 = vmatmul.msk.f32.gmra.mxu3 %vm478_vm3, %v2598_v39  ;;  %v2590_v39 = vld [vmem:[%s4234_s6 + $0x3] ss:$8 sm:$0x3] }
  0xf2   : > { %1126 = vmatpush.msrb.mxu2 %v1098_v41  ;;  %1149 = vmatpush.msrb.mxu3 %v1102_v42  ;;  %v3782_v41 = vperm.slane %v2583_v36, 1  ;;  %v3786_v44 = vperm.slane %v2590_v39, 0  ;;  %v2624_v36 = vld [vmem:[%s4234_s6 + $0x10] ss:$8 sm:$0x3] }
  0xf3   : > { %v2962_v2 = vpop.permute.xlu0 %2961 }
  0xf4   : > { %1127 = vmatpush.msrb.mxu2 %v1097_v6  ;;  %1150 = vmatpush.msrb.mxu3 %v1101_v7  ;;  %v2964_v4 = vunpack.i.h.bf16 %v2962_v2  ;;  %v2963_v45 = vunpack.i.l.bf16 %v2962_v2  ;;  %v2967_v46 = vpop.permute.xlu1 %2966  ;;  %v3788_v2 = vperm.slane %v2590_v39, 1 }
  0xf5   : > { %2607 = vmatmul.msk.f32.gmra.mxu0 %vm478_vm3, %v2605_v43  ;;  %2609 = vmatmul.msk.f32.gmra.mxu1 %vm478_vm3, %v2605_v43  ;;  %v2969_v49 = vunpack.i.h.bf16 %v2967_v46  ;;  %v2968_v50 = vunpack.i.l.bf16 %v2967_v46 }
  0xf6   : > { %v1096_v52 = vsel %vm1095_vm7, %v2963_v45, %v2964_v4  ;;  %v1100_v8 = vsel %vm1095_vm7, %v2964_v4, %v2963_v45 }
  0xf7   : > { %1128 = vmatpush.msrb.mxu2 %v1096_v52  ;;  %1151 = vmatpush.msrb.mxu3 %v1100_v8  ;;  %v1194_v9 = vsel %vm1190_vm8, %v2968_v50, %v2969_v49  ;;  %v1198_v53 = vsel %vm1190_vm8, %v2969_v49, %v2968_v50  ;;  %v2603_v50 = vld [vmem:[%s4234_s6 + $0x5] ss:$8 sm:$0x3] }
  0xf8   : > { %1220 = vmatpush.msra.mxu0 %v1194_v9  ;;  %1243 = vmatpush.msra.mxu1 %v1198_v53 }
  0xf9   : > { %2613 = vmatmul.msk.f32.vlgmr.msrb.gmra.mxu2 %vm478_vm3, %v2611_v51  ;;  %2615 = vmatmul.msk.f32.vlgmr.msrb.gmra.mxu3 %vm478_vm3, %v2611_v51 }
  0xfa   : > { %1221 = vmatpush.msra.mxu0 %v1193_v54  ;;  %1244 = vmatpush.msra.mxu1 %v1197_v55  ;;  %v3799_v55 = vperm.slane %v2603_v50, 0 }
  0xfb   : > { %v2977_v56 = vpop.permute.xlu0 %2976 }
  0xfc   : > { %v2979_v57 = vunpack.i.h.bf16 %v2977_v56  ;;  %v2978_v58 = vunpack.i.l.bf16 %v2977_v56  ;;  %v2982_v59 = vpop.permute.xlu1 %2981  ;;  %v3801_v56 = vperm.slane %v2603_v50, 1 }
  0xfd   : > { %v2984_v60 = vunpack.i.h.bf16 %v2982_v59  ;;  %v2983_v61 = vunpack.i.l.bf16 %v2982_v59  ;;  %v2610_v59 = vld [vmem:[%s4234_s6 + $0x6] ss:$8 sm:$0x3] }
  0xfe   : > { %v1192_v63 = vsel %vm1190_vm8, %v2978_v58, %v2979_v57  ;;  %v1196_v3 = vsel %vm1190_vm8, %v2979_v57, %v2978_v58 }
  0xff   : > { %1222 = vmatpush.msra.mxu0 %v1192_v63  ;;  %1245 = vmatpush.msra.mxu1 %v1196_v3  ;;  %v1191_v5 = vsel %vm1190_vm8, %v2983_v61, %v2984_v60  ;;  %v1195_v10 = vsel %vm1190_vm8, %v2984_v60, %v2983_v61 }
 0x101   : > { %2614 = vmatmul.msk.f32.gmra.mxu2 %vm478_vm3, %v2612_v62  ;;  %2616 = vmatmul.msk.f32.gmra.mxu3 %vm478_vm3, %v2612_v62 }
 0x102   : > { %1223 = vmatpush.msra.mxu0 %v1191_v5  ;;  %1246 = vmatpush.msra.mxu1 %v1195_v10 }
 0x103   : > { %2620 = vmatmul.msk.f32.vlgmr.msra.gmra.mxu0 %vm478_vm3, %v2618_v11  ;;  %2622 = vmatmul.msk.f32.vlgmr.msra.gmra.mxu1 %vm478_vm3, %v2618_v11 }
 0x10b   : > { %2621 = vmatmul.msk.f32.gmra.mxu0 %vm478_vm3, %v2619_v12  ;;  %2623 = vmatmul.msk.f32.gmra.mxu1 %vm478_vm3, %v2619_v12  ;;  %v2617_v12 = vld [vmem:[%s4234_s6 + $0x7] ss:$8 sm:$0x3]  ;;  %vm2279_vm3 = vcmask 785408  }
 0x139   : > { %v502_v14 = vpop.f32.mrf.mxu0  ;;  %v525_v15 = vpop.f32.mrf.mxu1 }
 0x13a   : > { %v537_v46 = vmul.f32 %v3776_v40, %v502_v14  ;;  %v538_v47 = vmul.f32 %v3778_v0, %v525_v15 }
 0x141   : > { %v505_v16 = vpop.f32.mrf.mxu0  ;;  %v528_v17 = vpop.f32.mrf.mxu1 }
 0x142   : > { %v539_v3 = vmul.f32 %v3776_v40, %v505_v16  ;;  %v540_v5 = vmul.f32 %v3778_v0, %v528_v17 }
 0x145   : > { %v596_v18 = vpop.f32.mrf.mxu2  ;;  %v619_v19 = vpop.f32.mrf.mxu3 }
 0x146   : > { %v632_v7 = vmul.f32 %v3769_v37, %v596_v18  ;;  %v633_v43 = vmul.f32 %v3771_v38, %v619_v19  ;;  %v3817_v18 = vperm.slane %v2610_v59, 0  ;;  %v3819_v19 = vperm.slane %v2610_v59, 1 }
 0x148   : > { %v636_v51 = vadd.f32 %v632_v7, %v537_v46  ;;  %v637_v52 = vadd.f32 %v633_v43, %v538_v47  ;;  %v3834_v47 = vperm.slane %v2624_v36, 0 }
 0x149   : > { %v691_v20 = vpop.f32.mrf.mxu0  ;;  %v714_v21 = vpop.f32.mrf.mxu1 }
 0x14a   : > { %v727_v48 = vmul.f32 %v3780_v1, %v691_v20  ;;  %v728_v49 = vmul.f32 %v3782_v41, %v714_v21 }
 0x14c   : > { %v731_v53 = vadd.f32 %v727_v48, %v636_v51  ;;  %v732_v54 = vadd.f32 %v728_v49, %v637_v52  ;;  %v3836_v48 = vperm.slane %v2624_v36, 1  ;;  %v1279_v36 = vpop.permute.xlu2 %1278 }
 0x14d   : > { %v599_v24 = vpop.f32.mrf.mxu2  ;;  %v622_v25 = vpop.f32.mrf.mxu3 }
 0x14e   : > { %v634_v57 = vmul.f32 %v3769_v37, %v599_v24  ;;  %v635_v58 = vmul.f32 %v3771_v38, %v622_v25 }
 0x150   : > { %v638_v20 = vadd.f32 %v634_v57, %v539_v3  ;;  %v639_v16 = vadd.f32 %v635_v58, %v540_v5 }
 0x151   : > { %v694_v22 = vpop.f32.mrf.mxu0  ;;  %v717_v23 = vpop.f32.mrf.mxu1 }
 0x152   : > { %v729_v10 = vmul.f32 %v3780_v1, %v694_v22  ;;  %v730_v11 = vmul.f32 %v3782_v41, %v717_v23 }
 0x154   : > { %v733_v34 = vadd.f32 %v729_v10, %v638_v20  ;;  %v734_v35 = vadd.f32 %v730_v11, %v639_v16 }
 0x15a   : > { %v856_v26 = vpop.f32.mrf.mxu0  ;;  %v879_v27 = vpop.f32.mrf.mxu1 }
 0x15c   : > { %v786_v28 = vpop.f32.mrf.mxu2  ;;  %v809_v29 = vpop.f32.mrf.mxu3 }
 0x15d   : > { %v822_v8 = vmul.f32 %v3786_v44, %v786_v28  ;;  %v823_v9 = vmul.f32 %v3788_v2, %v809_v29  ;;  %v3823_v28 = vperm.slane %v2617_v12, 0  ;;  %v3825_v29 = vperm.slane %v2617_v12, 1 }
 0x15f   : > { %v826_v62 = vadd.f32 %v822_v8, %v731_v53  ;;  %v827_v63 = vadd.f32 %v823_v9, %v732_v54 }
 0x161   : > { %v885_v24 = vadd.f32 %v856_v26, %v826_v62  ;;  %v886_v25 = vadd.f32 %v879_v27, %v827_v63 }
 0x162   : > { %v3756_v30 = vpop.f32.mrf.mxu0  ;;  %v3758_v31 = vpop.f32.mrf.mxu1 }
 0x164   : > { %v789_v32 = vpop.f32.mrf.mxu2  ;;  %v812_v33 = vpop.f32.mrf.mxu3 }
 0x165   : > { %v824_v17 = vmul.f32 %v3786_v44, %v789_v32  ;;  %v825_v21 = vmul.f32 %v3788_v2, %v812_v33 }
 0x167   : > { %v829_v7 = vadd.f32 %v825_v21, %v734_v35 }
 0x169   : > { %v888_v52 = vadd.f32 %v3758_v31, %v829_v7 }
 0x16a   : > { %v1035_v4 = vpop.f32.mrf.mxu0  ;;  %v1058_v45 = vpop.f32.mrf.mxu1 }
 0x16b   : > { %v1071_v32 = vmul.f32 %v3817_v18, %v1035_v4  ;;  %v1072_v33 = vmul.f32 %v3819_v19, %v1058_v45 }
 0x16c   : > { %v940_v42 = vpop.f32.mrf.mxu2  ;;  %v963_v6 = vpop.f32.mrf.mxu3 }
 0x16d   : > { %v976_v14 = vmul.f32 %v3799_v55, %v940_v42  ;;  %v977_v15 = vmul.f32 %v3801_v56, %v963_v6  ;;  %v828_v6 = vadd.f32 %v824_v17, %v733_v34 }
 0x16f   : > { %v980_v39 = vadd.f32 %v976_v14, %v885_v24  ;;  %v981_v42 = vadd.f32 %v977_v15, %v886_v25  ;;  %v887_v45 = vadd.f32 %v3756_v30, %v828_v6 }
 0x171   : > { %v1075_v50 = vadd.f32 %v1071_v32, %v980_v39  ;;  %v1076_v51 = vadd.f32 %v1072_v33, %v981_v42 }
 0x172   : > { %v1038_v22 = vpop.f32.mrf.mxu0  ;;  %v1061_v23 = vpop.f32.mrf.mxu1 }
 0x173   : > { %v1073_v62 = vmul.f32 %v3817_v18, %v1038_v22  ;;  %v1074_v3 = vmul.f32 %v3819_v19, %v1061_v23 }
 0x174   : > { %v943_v60 = vpop.f32.mrf.mxu2  ;;  %v966_v61 = vpop.f32.mrf.mxu3 }
 0x175   : > { %v978_v49 = vmul.f32 %v3799_v55, %v943_v60  ;;  %v979_v4 = vmul.f32 %v3801_v56, %v966_v61  ;;  %v1274_v60 = vpop.permute.xlu0 %1273 }
 0x177   : > { %v982_v59 = vadd.f32 %v978_v49, %v887_v45  ;;  %v983_v63 = vadd.f32 %v979_v4, %v888_v52 }
 0x179   : > { %v1077_v15 = vadd.f32 %v1073_v62, %v982_v59  ;;  %v1078_v20 = vadd.f32 %v1074_v3, %v983_v63 }
 0x17c   : > { %v1130_v26 = vpop.f32.mrf.mxu2  ;;  %v1153_v27 = vpop.f32.mrf.mxu3 }
 0x17d   : > { %v1166_v43 = vmul.f32 %v3823_v28, %v1130_v26  ;;  %v1167_v46 = vmul.f32 %v3825_v29, %v1153_v27  ;;  %v1824_v27 = vld [vmem:[%s4232_s4] sm:$0xff] }
 0x17f   : > { %v1170_v53 = vadd.f32 %v1166_v43, %v1075_v50  ;;  %v1171_v54 = vadd.f32 %v1167_v46, %v1076_v51 }
 0x180   : > { %v1225_v8 = vpop.f32.mrf.mxu0  ;;  %v1248_v9 = vpop.f32.mrf.mxu1 }
 0x181   : > { %v1261_v57 = vmul.f32 %v3834_v47, %v1225_v8  ;;  %v1262_v58 = vmul.f32 %v3836_v48, %v1248_v9 }
 0x183   : > { %v1265_v61 = vadd.f32 %v1261_v57, %v1170_v53  ;;  %v1266_v5 = vadd.f32 %v1262_v58, %v1171_v54 }
 0x184   : > { %v1133_v30 = vpop.f32.mrf.mxu2  ;;  %v1156_v10 = vpop.f32.mrf.mxu3 }
 0x185   : > { %v3846_v31 = vadd.f32 %v1274_v60, %v1265_v61  ;;  %v3848_v11 = vadd.f32 %v1274_v60, %v1266_v5  ;;  %v1168_v12 = vmul.f32 %v3823_v28, %v1133_v30  ;;  %v1169_v14 = vmul.f32 %v3825_v29, %v1156_v10  ;;  %v1301_v5 = vld [vmem:[%s4231_s3] sm:$0xff] }
 0x187   : > { %v1285_v16 = vmax.f32 %v3846_v31, 0.0  ;;  %v1286_v17 = vmax.f32 %v3848_v11, 0.0  ;;  %v1172_v21 = vadd.f32 %v1168_v12, %v1077_v15  ;;  %v1173_v24 = vadd.f32 %v1169_v14, %v1078_v20  ;;  %v2630_v12 = vld [vmem:[%s4231_s3 + $0x10] sm:$0xff] }
 0x188   : > { %v1228_v22 = vpop.f32.mrf.mxu0  ;;  %v1251_v23 = vpop.f32.mrf.mxu1 }
 0x189   : > { %v1263_v25 = vmul.f32 %v3834_v47, %v1228_v22  ;;  %v1264_v34 = vmul.f32 %v3836_v48, %v1251_v23  ;;  %v2987_v35 = vpack.i.bf16 %v1286_v17, %v1285_v16 }
 0x18b   : > { %v1267_v39 = vadd.f32 %v1263_v25, %v1172_v21  ;;  %v1268_v42 = vadd.f32 %v1264_v34, %v1173_v24  ;;  %2988 = vrot.lane.b32.xlu2 %v2987_v35, %s3255_s24  ;;  %v2627_v34 = vld [vmem:[%s4231_s3 + $0x8] sm:$0xff] }
 0x18d   : > { %v1283_v32 = vadd.f32 %v1279_v36, %v1267_v39  ;;  %v1284_v33 = vadd.f32 %v1279_v36, %v1268_v42 }
 0x18f   : > { %v1287_v6 = vmax.f32 %v1283_v32, 0.0  ;;  %v1288_v7 = vmax.f32 %v1284_v33, 0.0 }
 0x191   : > { %v3012_v26 = vpack.i.bf16 %v1288_v7, %v1287_v6 }
 0x193   : > { %2993 = vrot.lane.b32.xlu2 %v2987_v35, %s3256_s28  ;;  %3013 = vrot.lane.b32.xlu0 %v3012_v26, %s3257_s11 }
 0x194   : > { %3003 = vrot.lane.b32.xlu1 %v3012_v26, %s3255_s24 }
 0x19b   : > { %2998 = vrot.lane.b32.xlu2 %v2987_v35, %s3257_s11  ;;  %3018 = vrot.lane.b32.xlu0 %v2987_v35, %s3258_s12  ;;  %s2669_s11 = sld [smem:[#allocation8 + $0x1]] }
 0x19c   : > { %3008 = vrot.lane.b32.xlu1 %v3012_v26, %s3256_s28 }
 0x1a3   : > { %3023 = vrot.lane.b32.xlu2 %v2987_v35, %s3259_s29  ;;  %3043 = vrot.lane.b32.xlu0 %v3012_v26, %s3260_s21 }
 0x1a4   : > { %3033 = vrot.lane.b32.xlu1 %v3012_v26, %s3258_s12  ;;  %s426_s12 = sand.u32 1, %s3224_s14  }
 0x1ab   : > { %3028 = vrot.lane.b32.xlu2 %v2987_v35, %s3260_s21  ;;  %3048 = vrot.lane.b32.xlu0 %v2987_v35, %s3261_s30 }
 0x1ac   : > { %3038 = vrot.lane.b32.xlu1 %v3012_v26, %s3259_s29  ;;  %s2704_s29 = smul.u32 224, %s426_s12 }
 0x1ae   : > { %s4111_s21 = scalar_lea.vmem [#allocation9], %s2704_s29  ;;  %s3162_s29 = scalar_lea.hbm %s4238_s10, 896 }
 0x1b3   : > { %3063 = vrot.lane.b32.xlu2 %v2987_v35, %s3262_s23  ;;  %1827 = vperm.xlu0 %2986, %v1824_v27  }
 0x1b4   : > { %3053 = vrot.lane.b32.xlu1 %v3012_v26, %s3261_s30 }
 0x1bc   : > { %3058 = vrot.lane.b32.xlu1 %v3012_v26, %s3262_s23  ;;  %s1879_s23 = sld [smem:[#allocation8]] }
 0x1e5   : > { %v2989_v43 = vpop.permute.xlu2 %2988 }
 0x1e6   : > { %v2991_v9 = vunpack.i.h.bf16 %v2989_v43  ;;  %v2990_v53 = vunpack.i.l.bf16 %v2989_v43 }
 0x1e8   : > { %v1299_v30 = vsel %vm467_vm1, %v2991_v9, %v2990_v53  ;;  %v1297_v10 = vsel %vm467_vm1, %v2990_v53, %v2991_v9  ;;  %v2642_v9 = vld [vmem:[%s4231_s3 + $0x30] sm:$0xff] }
 0x1ed   : > { %v2994_v46 = vpop.permute.xlu2 %2993 }
 0x1ee   : > { %v2996_v20 = vunpack.i.h.bf16 %v2994_v46  ;;  %v2995_v21 = vunpack.i.l.bf16 %v2994_v46 }
 0x1f0   : > { %v1360_v31 = vsel %vm561_vm0, %v2996_v20, %v2995_v21  ;;  %v1358_v11 = vsel %vm561_vm0, %v2995_v21, %v2996_v20 }
 0x1f5   : > { %v2999_v49 = vpop.permute.xlu2 %2998 }
 0x1f6   : > { %v3001_v51 = vunpack.i.h.bf16 %v2999_v49  ;;  %v3000_v4 = vunpack.i.l.bf16 %v2999_v49 }
 0x1f8   : > { %v1421_v3 = vsel %vm656_vm2, %v3001_v51, %v3000_v4  ;;  %v1419_v61 = vsel %vm656_vm2, %v3000_v4, %v3001_v51 }
 0x1fd   : > { %v3883_v62 = vpop.permute.xlu2 %3023 }
 0x205   : > { %v3014_v50 = vpop.permute.xlu0 %3013  ;;  %v3029_v35 = vpop.permute.xlu2 %3028 }
 0x206   : > { %v3016_v45 = vunpack.i.h.bf16 %v3014_v50  ;;  %v3015_v52 = vunpack.i.l.bf16 %v3014_v50  ;;  %v3004_v8 = vpop.permute.xlu1 %3003  ;;  %v3031_v36 = vunpack.i.h.bf16 %v3029_v35  ;;  %v3030_v39 = vunpack.i.l.bf16 %v3029_v35 }
 0x207   : > { %v3006_v54 = vunpack.i.h.bf16 %v3004_v8  ;;  %v3005_v57 = vunpack.i.l.bf16 %v3004_v8 }
 0x208   : > { %v1422_v58 = vsel %vm656_vm2, %v3016_v45, %v3015_v52  ;;  %v1420_v59 = vsel %vm656_vm2, %v3015_v52, %v3016_v45  ;;  %v1649_v51 = vsel %vm1000_vm5, %v3030_v39, %v3031_v36  ;;  %v1651_v4 = vsel %vm1000_vm5, %v3031_v36, %v3030_v39  ;;  %v2633_v45 = vld [vmem:[%s4231_s3 + $0x18] sm:$0xff]  ;;  %v2648_v39 = vld [vmem:[%s4231_s3 + $0x40] sm:$0xff] }
 0x209   : > { %v1300_v60 = vsel %vm467_vm1, %v3006_v54, %v3005_v57  ;;  %v1298_v63 = vsel %vm467_vm1, %v3005_v57, %v3006_v54  ;;  %1442 = vmatpush.msrb.mxu0 %v1422_v58  ;;  %1462 = vmatpush.msrb.mxu1 %v1420_v59  ;;  %v3026_v54 = vunpack.i.h.bf16 %v3883_v62  ;;  %v3025_v57 = vunpack.i.l.bf16 %v3883_v62 }
 0x20a   : > { %1320 = vmatpush.msra.mxu2 %v1300_v60  ;;  %1340 = vmatpush.msra.mxu3 %v1298_v63  ;;  %vm1953_vm1 = vcmask 1046528   ;;  %vm2180_vm2 = vcmask 523264  }
 0x20b   : > { %1443 = vmatpush.msrb.mxu0 %v1421_v3  ;;  %1463 = vmatpush.msrb.mxu1 %v1419_v61  ;;  %v2639_v3 = vld [vmem:[%s4231_s3 + $0x28] sm:$0xff]  ;;  %v1588_v62 = vsel %vm905_vm6, %v3025_v57, %v3026_v54  ;;  %v1590_v61 = vsel %vm905_vm6, %v3026_v54, %v3025_v57 }
 0x20c   : > { %1321 = vmatpush.msra.mxu2 %v1299_v30  ;;  %1341 = vmatpush.msra.mxu3 %v1297_v10 }
 0x20d   : > { %2625 = vmatmul.msk.f32.vlgmr.msra.gmra.mxu2 %vm1302_vm9, %v1301_v5  ;;  %2626 = vmatmul.msk.f32.vlgmr.msra.gmra.mxu3 %vm1302_vm9, %v1301_v5  ;;  %v3019_v14 = vpop.permute.xlu0 %3018 }
 0x20e   : > { %1552 = vmatpush.msra.mxu0 %v1287_v6  ;;  %1572 = vmatpush.msra.mxu1 %v1288_v7  ;;  %v3009_v15 = vpop.permute.xlu1 %3008  ;;  %v3021_v6 = vunpack.i.h.bf16 %v3019_v14  ;;  %v3020_v7 = vunpack.i.l.bf16 %v3019_v14 }
 0x20f   : > { %v3011_v22 = vunpack.i.h.bf16 %v3009_v15  ;;  %v3010_v23 = vunpack.i.l.bf16 %v3009_v15  ;;  %2631 = vmatmul.msk.f32.vlgmr.msrb.gmra.mxu0 %vm1302_vm9, %v2630_v12  ;;  %2632 = vmatmul.msk.f32.vlgmr.msrb.gmra.mxu1 %vm1302_vm9, %v2630_v12 }
 0x210   : > { %1553 = vmatpush.msra.mxu0 %v1285_v16  ;;  %1573 = vmatpush.msra.mxu1 %v1286_v17  ;;  %v2636_v16 = vld [vmem:[%s4231_s3 + $0x20] sm:$0xff]  ;;  %v1482_v52 = vsel %vm751_vm4, %v3021_v6, %v3020_v7  ;;  %v1480_v8 = vsel %vm751_vm4, %v3020_v7, %v3021_v6 }
 0x211   : > { %v1361_v24 = vsel %vm561_vm0, %v3011_v22, %v3010_v23  ;;  %v1359_v25 = vsel %vm561_vm0, %v3010_v23, %v3011_v22  ;;  %v2645_v22 = vld [vmem:[%s4231_s3 + $0x38] sm:$0xff]  ;;  %vm1951_vm0 = vcmask 1045504  }
 0x212   : > { %1381 = vmatpush.msrb.mxu2 %v1361_v24  ;;  %1401 = vmatpush.msrb.mxu3 %v1359_v25  ;;  %v3064_v25 = vpop.permute.xlu2 %3063 }
 0x213   : > { %v3066_v35 = vunpack.i.h.bf16 %v3064_v25 }
 0x214   : > { %1382 = vmatpush.msrb.mxu2 %v1360_v31  ;;  %1402 = vmatpush.msrb.mxu3 %v1358_v11  ;;  %v3065_v31 = vunpack.i.l.bf16 %v3064_v25 }
 0x215   : > { %2628 = vmatmul.msk.f32.vlgmr.msrb.gmra.mxu2 %vm1302_vm9, %v2627_v34  ;;  %2629 = vmatmul.msk.f32.vlgmr.msrb.gmra.mxu3 %vm1302_vm9, %v2627_v34  ;;  %v3044_v17 = vpop.permute.xlu0 %3043 }
 0x216   : > { %v3046_v42 = vunpack.i.h.bf16 %v3044_v17  ;;  %v3045_v32 = vunpack.i.l.bf16 %v3044_v17  ;;  %v3034_v33 = vpop.permute.xlu1 %3033 }
 0x217   : > { %v3036_v26 = vunpack.i.h.bf16 %v3034_v33  ;;  %v3035_v27 = vunpack.i.l.bf16 %v3034_v33  ;;  %2637 = vmatmul.msk.f32.vlgmr.msra.gmra.mxu0 %vm1302_vm9, %v2636_v16  ;;  %2638 = vmatmul.msk.f32.vlgmr.msra.gmra.mxu1 %vm1302_vm9, %v2636_v16 }
 0x218   : > { %v1650_v43 = vsel %vm1000_vm5, %v3045_v32, %v3046_v42  ;;  %v1652_v46 = vsel %vm1000_vm5, %v3046_v42, %v3045_v32  ;;  %v1771_v42 = vsel %vm1190_vm8, %v3065_v31, %v3066_v35  ;;  %v1773_v32 = vsel %vm1190_vm8, %v3066_v35, %v3065_v31 }
 0x219   : > { %v1483_v49 = vsel %vm751_vm4, %v3036_v26, %v3035_v27  ;;  %v1481_v50 = vsel %vm751_vm4, %v3035_v27, %v3036_v26  ;;  %1672 = vmatpush.msrb.mxu0 %v1650_v43  ;;  %1692 = vmatpush.msrb.mxu1 %v1652_v46 }
 0x21a   : > { %1503 = vmatpush.msra.mxu2 %v1483_v49  ;;  %1523 = vmatpush.msra.mxu3 %v1481_v50 }
 0x21b   : > { %1673 = vmatpush.msrb.mxu0 %v1649_v51  ;;  %1693 = vmatpush.msrb.mxu1 %v1651_v4 }
 0x21c   : > { %1504 = vmatpush.msra.mxu2 %v1482_v52  ;;  %1524 = vmatpush.msra.mxu3 %v1480_v8 }
 0x21d   : > { %2634 = vmatmul.msk.f32.vlgmr.msra.gmra.mxu2 %vm1302_vm9, %v2633_v45  ;;  %2635 = vmatmul.msk.f32.vlgmr.msra.gmra.mxu3 %vm1302_vm9, %v2633_v45  ;;  %v3049_v5 = vpop.permute.xlu0 %3048 }
 0x21e   : > { %v3039_v53 = vpop.permute.xlu1 %3038  ;;  %v3051_v10 = vunpack.i.h.bf16 %v3049_v5  ;;  %v3050_v12 = vunpack.i.l.bf16 %v3049_v5 }
 0x21f   : > { %v3041_v58 = vunpack.i.h.bf16 %v3039_v53  ;;  %v3040_v59 = vunpack.i.l.bf16 %v3039_v53  ;;  %2643 = vmatmul.msk.f32.vlgmr.msrb.gmra.mxu0 %vm1302_vm9, %v2642_v9  ;;  %2644 = vmatmul.msk.f32.vlgmr.msrb.gmra.mxu1 %vm1302_vm9, %v2642_v9 }
 0x220   : > { %v1710_v23 = vsel %vm1095_vm7, %v3050_v12, %v3051_v10  ;;  %v1712_v24 = vsel %vm1095_vm7, %v3051_v10, %v3050_v12 }
 0x221   : > { %v1589_v60 = vsel %vm905_vm6, %v3040_v59, %v3041_v58  ;;  %v1591_v63 = vsel %vm905_vm6, %v3041_v58, %v3040_v59 }
 0x222   : > { %1611 = vmatpush.msrb.mxu2 %v1589_v60  ;;  %1631 = vmatpush.msrb.mxu3 %v1591_v63 }
 0x224   : > { %1612 = vmatpush.msrb.mxu2 %v1588_v62  ;;  %1632 = vmatpush.msrb.mxu3 %v1590_v61 }
 0x225   : > { %2640 = vmatmul.msk.f32.vlgmr.msrb.gmra.mxu2 %vm1302_vm9, %v2639_v3  ;;  %2641 = vmatmul.msk.f32.vlgmr.msrb.gmra.mxu3 %vm1302_vm9, %v2639_v3  ;;  %v1828_v35 = vpop.permute.xlu0 %1827 }
 0x226   : > { %v3054_v30 = vpop.permute.xlu1 %3053 }
 0x227   : > { %v3056_v14 = vunpack.i.h.bf16 %v3054_v30  ;;  %v3055_v15 = vunpack.i.l.bf16 %v3054_v30 }
 0x229   : > { %v1711_v20 = vsel %vm1095_vm7, %v3055_v15, %v3056_v14  ;;  %v1713_v21 = vsel %vm1095_vm7, %v3056_v14, %v3055_v15 }
 0x22a   : > { %1733 = vmatpush.msra.mxu2 %v1711_v20  ;;  %1753 = vmatpush.msra.mxu3 %v1713_v21 }
 0x22c   : > { %1734 = vmatpush.msra.mxu2 %v1710_v23  ;;  %1754 = vmatpush.msra.mxu3 %v1712_v24 }
 0x22d   : > { %2646 = vmatmul.msk.f32.vlgmr.msra.gmra.mxu2 %vm1302_vm9, %v2645_v22  ;;  %2647 = vmatmul.msk.f32.vlgmr.msra.gmra.mxu3 %vm1302_vm9, %v2645_v22 }
 0x22e   : > { %v3059_v34 = vpop.permute.xlu1 %3058 }
 0x22f   : > { %v3061_v11 = vunpack.i.h.bf16 %v3059_v34  ;;  %v3060_v16 = vunpack.i.l.bf16 %v3059_v34 }
 0x231   : > { %v1772_v17 = vsel %vm1190_vm8, %v3060_v16, %v3061_v11  ;;  %v1774_v36 = vsel %vm1190_vm8, %v3061_v11, %v3060_v16 }
 0x232   : > { %1794 = vmatpush.msra.mxu0 %v1772_v17  ;;  %1814 = vmatpush.msra.mxu1 %v1774_v36  ;;  %v1834_v17 = vld [vmem:[#allocation2] sm:$0xff] }
 0x234   : > { %1795 = vmatpush.msra.mxu0 %v1771_v42  ;;  %1815 = vmatpush.msra.mxu1 %v1773_v32 }
 0x235   : > { %2649 = vmatmul.msk.f32.vlgmr.msra.gmra.mxu0 %vm1302_vm9, %v2648_v39  ;;  %2650 = vmatmul.msk.f32.vlgmr.msra.gmra.mxu1 %vm1302_vm9, %v2648_v39 }
 0x28c   : > { %v1445_v7 = vpop.f32.mrf.mxu0  ;;  %v1465_v26 = vpop.f32.mrf.mxu1 }
 0x28d   : > { %v1469_v13 = vmul.f32 %v1465_v26, %v3782_v41  ;;  %v1468_v57 = vmul.f32 %v1445_v7, %v3780_v1 }
 0x290   : > { %v1323_v33 = vpop.f32.mrf.mxu2  ;;  %v1343_v6 = vpop.f32.mrf.mxu3 }
 0x291   : > { %v1347_v27 = vmul.f32 %v1343_v6, %v3778_v0  ;;  %v1346_v52 = vmul.f32 %v1323_v33, %v3776_v40 }
 0x294   : > { %v1555_v4 = vpop.f32.mrf.mxu0  ;;  %v1575_v45 = vpop.f32.mrf.mxu1 }
 0x298   : > { %v1384_v43 = vpop.f32.mrf.mxu2  ;;  %v1404_v46 = vpop.f32.mrf.mxu3 }
 0x299   : > { %v1408_v49 = vmul.f32 %v1404_v46, %v3771_v38  ;;  %v1407_v51 = vmul.f32 %v1384_v43, %v3769_v37 }
 0x29b   : > { %v1410_v50 = vadd.f32 %v1408_v49, %v1347_v27  ;;  %v1409_v54 = vadd.f32 %v1407_v51, %v1346_v52  ;;  %v2021_v52 = vld [vmem:[#allocation6 + $0x30] sm:$0xff] }
 0x29c   : > { %v1675_v63 = vpop.f32.mrf.mxu0  ;;  %v1695_v37 = vpop.f32.mrf.mxu1 }
 0x29d   : > { %v1471_v8 = vadd.f32 %v1469_v13, %v1410_v50  ;;  %v1470_v59 = vadd.f32 %v1468_v57, %v1409_v54  ;;  %v1699_v1 = vmul.f32 %v1695_v37, %v3819_v19  ;;  %v2019_v54 = vld [vmem:[#allocation6 + $0x20] sm:$0xff]  ;;  %v2020_v57 = vld [vmem:[#allocation6 + $0x28] sm:$0xff]  ;;  %v2123_v37 = vld [vmem:[#allocation6 + $0x70] sm:$0xff] }
 0x2a0   : > { %v1506_v9 = vpop.f32.mrf.mxu2  ;;  %v1526_v53 = vpop.f32.mrf.mxu3 }
 0x2a1   : > { %v1530_v0 = vmul.f32 %v1526_v53, %v3788_v2  ;;  %v1529_v58 = vmul.f32 %v1506_v9, %v3786_v44  ;;  %v1698_v2 = vmul.f32 %v1675_v63, %v3817_v18  ;;  %v1962_v9 = vld [vmem:[#allocation6] sm:$0xff]  ;;  %v1963_v53 = vld [vmem:[#allocation6 + $0x8] sm:$0xff]  ;;  %v2073_v63 = vld [vmem:[#allocation6 + $0x58] sm:$0xff] }
 0x2a3   : > { %v1532_v38 = vadd.f32 %v1530_v0, %v1471_v8  ;;  %v1531_v60 = vadd.f32 %v1529_v58, %v1470_v59  ;;  %v2022_v8 = vld [vmem:[#allocation6 + $0x38] sm:$0xff] }
 0x2a5   : > { %v1579_v41 = vadd.f32 %v1575_v45, %v1532_v38  ;;  %v1578_v5 = vadd.f32 %v1555_v4, %v1531_v60  ;;  %v1964_v4 = vld [vmem:[#allocation6 + $0x10] sm:$0xff]  ;;  %v1965_v45 = vld [vmem:[#allocation6 + $0x18] sm:$0xff] }
 0x2a6   : > { %1986 = vmatpush.msrb.mxu0 %v1964_v4  ;;  %2009 = vmatpush.msrb.mxu1 %v1965_v45 }
 0x2a8   : > { %v1614_v3 = vpop.f32.mrf.mxu2  ;;  %v1634_v62 = vpop.f32.mrf.mxu3  ;;  %1987 = vmatpush.msrb.mxu0 %v1962_v9  ;;  %2010 = vmatpush.msrb.mxu1 %v1963_v53 }
 0x2a9   : > { %v1637_v40 = vmul.f32 %v1614_v3, %v3799_v55  ;;  %v1638_v61 = vmul.f32 %v1634_v62, %v3801_v56  ;;  %v2124_v3 = vld [vmem:[#allocation6 + $0x78] sm:$0xff]  ;;  %v2070_v62 = vld [vmem:[#allocation6 + $0x40] sm:$0xff] }
 0x2aa   : > { %2111 = vmatpush.msra.mxu1 %v2073_v63 }
 0x2ab   : > { %v1640_v30 = vadd.f32 %v1638_v61, %v1579_v41  ;;  %v1639_v10 = vadd.f32 %v1637_v40, %v1578_v5  ;;  %v2072_v41 = vld [vmem:[#allocation6 + $0x50] sm:$0xff]  ;;  %v2071_v40 = vld [vmem:[#allocation6 + $0x48] sm:$0xff]  ;;  %v2121_v5 = vld [vmem:[#allocation6 + $0x60] sm:$0xff] }
 0x2ac   : > { %2088 = vmatpush.msra.mxu0 %v2072_v41  ;;  %2112 = vmatpush.msra.mxu1 %v2071_v40 }
 0x2ad   : > { %v1701_v44 = vadd.f32 %v1699_v1, %v1640_v30  ;;  %v1700_v15 = vadd.f32 %v1698_v2, %v1639_v10  ;;  %v2122_v30 = vld [vmem:[#allocation6 + $0x68] sm:$0xff] }
 0x2ae   : > { %2089 = vmatpush.msra.mxu0 %v2070_v62 }
 0x2b0   : > { %v1736_v12 = vpop.f32.mrf.mxu2  ;;  %v1756_v14 = vpop.f32.mrf.mxu3 }
 0x2b1   : > { %v1759_v20 = vmul.f32 %v1736_v12, %v3823_v28  ;;  %v1760_v21 = vmul.f32 %v1756_v14, %v3825_v29  ;;  %v1880_v28 = vstv %s1879_s23  ;;  %s2703_s23 = smul.u32 28, %s3232_s16 }
 0x2b2   : > { %v1797_v22 = vpop.f32.mrf.mxu0  ;;  %v1817_v23 = vpop.f32.mrf.mxu1 }
 0x2b3   : > { %v1761_v55 = vadd.f32 %v1759_v20, %v1700_v15  ;;  %v1762_v24 = vadd.f32 %v1760_v21, %v1701_v44  ;;  %v1820_v56 = vmul.f32 %v1797_v22, %v3834_v47  ;;  %v1821_v25 = vmul.f32 %v1817_v23, %v3836_v48 }
 0x2b5   : > { %v1822_v19 = vadd.f32 %v1820_v56, %v1761_v55  ;;  %v1823_v34 = vadd.f32 %v1821_v25, %v1762_v24 }
 0x2b7   : > { %v1830_v18 = vadd.f32 %v1828_v35, %v1822_v19  ;;  %v1831_v31 = vadd.f32 %v1828_v35, %v1823_v34 }
 0x2b9   : > { %v1832_v11 = vmax.f32 %v1830_v18, 0.0  ;;  %v1833_v16 = vmax.f32 %v1831_v31, 0.0 }
 0x2bb   : > { %1854 = vmatpush.msrb.mxu2 %v1832_v11  ;;  %1874 = vmatpush.msrb.mxu3 %v1833_v16 }
 0x2bc   : > { %2651 = vmatmul.msk.f32.vlgmr.msrb.gmra.mxu2 %vm1835_vm10, %v1834_v17  ;;  %2652 = vmatmul.msk.f32.vlgmr.msrb.gmra.mxu3 %vm1835_vm10, %v1834_v17 }
 0x2bd   : > { %2037 = vmatpush.msra.mxu2 %v2021_v52  ;;  %2060 = vmatpush.msra.mxu3 %v2022_v8 }
 0x2bf   : > { %2038 = vmatpush.msra.mxu2 %v2019_v54  ;;  %2061 = vmatpush.msra.mxu3 %v2020_v57 }
 0x2c1   : > { %2139 = vmatpush.msrb.mxu2 %v2123_v37  ;;  %2162 = vmatpush.msrb.mxu3 %v2124_v3 }
 0x2c3   : > { %2140 = vmatpush.msrb.mxu2 %v2121_v5  ;;  %2163 = vmatpush.msrb.mxu3 %v2122_v30 }
 0x33f   : > { %v1856_v29 = vpop.f32.mrf.mxu2  ;;  %v1876_v42 = vpop.f32.mrf.mxu3 }
 0x340   : > { %v1881_v36 = vadd.f32 %v1880_v28, %v1856_v29  ;;  %v4013_v7 = vadd.f32 %v1880_v28, %v1876_v42 }
 0x342   : > { %v1892_v47 = vrot.slane %v1881_v36, 5  ;;  %v1888_v39 = vrot.slane %v1881_v36, 6  ;;  %v1884_v48 = vrot.slane %v1881_v36, 7  ;;  %v1904_v32 = vrot.slane %v1881_v36, 2 }
 0x343   : > { %v1900_v33 = vrot.slane %v1881_v36, 3  ;;  %v1896_v6 = vrot.slane %v1881_v36, 4  ;;  %v1917_v26 = vrot.slane %v4013_v7, 6  ;;  %v1913_v27 = vrot.slane %v4013_v7, 7 }
 0x344   : > { %1893 = vrot.lane.b32.xlu0 %v1892_v47, %s3264_s22  ;;  %1889 = vrot.lane.b32.xlu2 %v1888_v39, %s3265_s26  ;;  %v1908_v43 = vrot.slane %v1881_v36, 1  ;;  %v1929_v46 = vrot.slane %v4013_v7, 3  ;;  %v1925_v49 = vrot.slane %v4013_v7, 4  ;;  %v1921_v50 = vrot.slane %v4013_v7, 5 }
 0x345   : > { %1885 = vrot.lane.b32.xlu1 %v1884_v48, %s3261_s30  ;;  %v1937_v13 = vrot.slane %v4013_v7, 1  ;;  %v1933_v51 = vrot.slane %v4013_v7, 2 }
 0x34c   : > { %1905 = vrot.lane.b32.xlu0 %v1904_v32, %s3266_s5  ;;  %1901 = vrot.lane.b32.xlu2 %v1900_v33, %s3267_s13 }
 0x34d   : > { %1897 = vrot.lane.b32.xlu1 %v1896_v6, %s3268_s15 }
 0x354   : > { %1918 = vrot.lane.b32.xlu0 %v1917_v26, %s3265_s26  ;;  %1914 = vrot.lane.b32.xlu2 %v1913_v27, %s3261_s30  ;;  %s434_s30 = smul.u32 14, %s3232_s16 }
 0x355   : > { %1909 = vrot.lane.b32.xlu1 %v1908_v43, %s3256_s28 }
 0x356   : > { %p435_p2 = scmp.lt.s32.totalorder %s434_s30, 27 }
 0x358   : > { %s4278_s30 = smov (!%p435_p2, %s434_s30), 27 }
 0x359   : > { %s2565_s18 = sshll.u32 %s4278_s30, 3 }
 0x35a   : > { %s4060_s24 = scalar_lea.vmem %s4236_s8, %s2565_s18  ;;  %s2412_s18 = scalar_lea.sflag [#allocation4], %s426_s12 }
 0x35b   : > { %v2295_v4 = vld [vmem:[%s4060_s24 + $0x48] sm:$0xff]  ;;  %v2174_v45 = vld [vmem:[%s4060_s24 + $0x10] sm:$0xff]  ;;  %v2175_v8 = vld [vmem:[%s4060_s24 + $0x18] sm:$0xff] }
 0x35c   : > { %1930 = vrot.lane.b32.xlu0 %v1929_v46, %s3267_s13  ;;  %1926 = vrot.lane.b32.xlu2 %v1925_v49, %s3268_s15  ;;  %v2293_v49 = vld [vmem:[%s4060_s24 + $0x38] sm:$0xff]  ;;  %v2296_v52 = vld [vmem:[%s4060_s24 + $0x50] sm:$0xff]  ;;  %s2427_s15 = sshll.u32 %s4111_s21, 4  ;;  %s2428_s15 = int_to_ptr.vmem [resolvable:$true] %s2427_s15 }
 0x35d   : > { %1922 = vrot.lane.b32.xlu1 %v1921_v50, %s3264_s22  ;;  %v2172_v50 = vld [vmem:[%s4060_s24] sm:$0xff]  ;;  %v2297_v9 = vld [vmem:[%s4060_s24 + $0x58] sm:$0xff]  ;;  %v2177_v57 = vld [vmem:[%s4060_s24 + $0x28] sm:$0xff]  ;;  %s2705_s22 = smul.u32 56, %s3236_s17 }
 0x35e   : > { %v2176_v53 = vld [vmem:[%s4060_s24 + $0x20] sm:$0xff] }
 0x35f   : > { %v2298_v54 = vld [vmem:[%s4060_s24 + $0x60] sm:$0xff]  ;;  %s2424_s26 = sadd.s32 %s2705_s22, %s2703_s23 }
 0x360   : > { %s2699_s16 = sshll.u32 %s2424_s26, 3 }
 0x361   : > { %s2426_s13 = scalar_lea.hbm %s4238_s10, %s2699_s16 }
 0x362   : > { %s2429_s30 = sshll.u32 %s2426_s13, 4  ;;  %s2430_s30 = int_to_ptr.hbm [resolvable:$true] %s2429_s30 }
 0x363   : > { %s3156_s19 = sshra.s32 %s2430_s30, 4  ;;  %s3157_s19 = int_to_ptr.hbm [resolvable:$true] %s3156_s19 }
 0x364   : > { %1938 = vrot.lane.b32.xlu2 %v1937_v13, %s3256_s28  ;;  %v2294_v13 = vld [vmem:[%s4060_s24 + $0x40] sm:$0xff]  ;;  %s3158_s25 = scalar_lea.hbm %s3157_s19, 224  ;;  %p3163_p7 = scmp.lt.s32.totalorder %s3157_s19, %s4238_s10 }
 0x365   : > { %1934 = vrot.lane.b32.xlu1 %v1933_v51, %s3266_s5  ;;  %v2173_v51 = vld [vmem:[%s4060_s24 + $0x8] sm:$0xff]  ;;  %p3159_p4 = scmp.ne.s32.totalorder %s3157_s19, %s3158_s25  ;;  %p3164_p9 = scmp.lt.s32.totalorder %s3162_s29, %s3158_s25 }
 0x367   : > { %p3160_p5 = pnand %p3159_p4, %p3377_p3  ;;  %p3165_p10 = por %p3164_p9, %p3163_p7 }
 0x369   : > { %p3161_p6 = pneg %p3160_p5 }
 0x36b   : > { %p3166_p11 = pnand %p3165_p10, %p3161_p6 }
 0x39e   : > { %v1890_v0 = vpop.permute.xlu2 %1889 }
 0x3a6   : > { %v1902_v59 = vpop.permute.xlu2 %1901 }
 0x3ae   : > { %v1915_v12 = vpop.permute.xlu2 %1914 }
 0x3af   : > { %v1955_v55 = vsel %vm1941_vm11, %v4013_v7, %v1915_v12 }
 0x3b6   : > { %v1894_v38 = vpop.permute.xlu0 %1893  ;;  %v1927_v23 = vpop.permute.xlu2 %1926 }
 0x3b7   : > { %v1886_v58 = vpop.permute.xlu1 %1885 }
 0x3b8   : > { %v1942_v60 = vsel %vm1941_vm11, %v1881_v36, %v1886_v58  ;;  %v2178_v58 = vld [vmem:[%s4060_s24 + $0x30] sm:$0xff] }
 0x3b9   : > { %v1944_v61 = vsel %vm1943_vm12, %v1942_v60, %v1890_v0  ;;  %v2299_v0 = vld [vmem:[%s4060_s24 + $0x68] sm:$0xff] }
 0x3ba   : > { %v1946_v10 = vsel %vm1945_vm13, %v1944_v61, %v1894_v38  ;;  %v4107_v38 = vstv %s2669_s11 }
 0x3be   : > { %v1906_v44 = vpop.permute.xlu0 %1905  ;;  %v1939_v31 = vpop.permute.xlu2 %1938 }
 0x3bf   : > { %v1898_v1 = vpop.permute.xlu1 %1897 }
 0x3c0   : > { %v1948_v2 = vsel %vm1947_vm14, %v1946_v10, %v1898_v1 }
 0x3c1   : > { %v1950_v14 = vsel %vm1949_vm15, %v1948_v2, %v1902_v59 }
 0x3c2   : > { %v1952_v15 = vsel %vm1951_vm0, %v1950_v14, %v1906_v44 }
 0x3c6   : > { %v1919_v22 = vpop.permute.xlu0 %1918 }
 0x3c7   : > { %v1910_v20 = vpop.permute.xlu1 %1909  ;;  %v1956_v56 = vsel %vm1943_vm12, %v1955_v55, %v1919_v22 }
 0x3c8   : > { %v1954_v21 = vsel %vm1953_vm1, %v1952_v15, %v1910_v20 }
 0x3c9   : > { %2653 = vmatmul.msk.f32.vlgmr.msrb.gmra.mxu0 %vm1302_vm9, %v1954_v21  ;;  %2655 = vmatmul.msk.f32.vlgmr.msrb.gmra.mxu1 %vm1302_vm9, %v1954_v21 }
 0x3ca   : > { %2657 = vmatmul.msk.f32.vlgmr.msra.gmra.mxu2 %vm1302_vm9, %v1954_v21  ;;  %2659 = vmatmul.msk.f32.vlgmr.msra.gmra.mxu3 %vm1302_vm9, %v1954_v21 }
 0x3ce   : > { %v1931_v34 = vpop.permute.xlu0 %1930 }
 0x3cf   : > { %v1923_v24 = vpop.permute.xlu1 %1922 }
 0x3d0   : > { %v1957_v25 = vsel %vm1945_vm13, %v1956_v56, %v1923_v24 }
 0x3d1   : > { %v1958_v19 = vsel %vm1947_vm14, %v1957_v25, %v1927_v23 }
 0x3d2   : > { %v1959_v35 = vsel %vm1949_vm15, %v1958_v19, %v1931_v34 }
 0x3d7   : > { %v1935_v18 = vpop.permute.xlu1 %1934 }
 0x3d8   : > { %v1960_v11 = vsel %vm1951_vm0, %v1959_v35, %v1935_v18 }
 0x3d9   : > { %v1961_v16 = vsel %vm1953_vm1, %v1960_v11, %v1939_v31 }
 0x3da   : > { %2654 = vmatmul.msk.f32.gmra.mxu0 %vm1302_vm9, %v1961_v16  ;;  %2656 = vmatmul.msk.f32.gmra.mxu1 %vm1302_vm9, %v1961_v16 }
 0x3db   : > { %2658 = vmatmul.msk.f32.gmra.mxu2 %vm1302_vm9, %v1961_v16  ;;  %2660 = vmatmul.msk.f32.gmra.mxu3 %vm1302_vm9, %v1961_v16 }
 0x3e2   : > { %2661 = vmatmul.msk.f32.vlgmr.msra.gmra.mxu0 %vm1302_vm9, %v1954_v21  ;;  %2663 = vmatmul.msk.f32.vlgmr.msra.gmra.mxu1 %vm1302_vm9, %v1954_v21 }
 0x3e3   : > { %2665 = vmatmul.msk.f32.vlgmr.msrb.gmra.mxu2 %vm1302_vm9, %v1954_v21  ;;  %2667 = vmatmul.msk.f32.vlgmr.msrb.gmra.mxu3 %vm1302_vm9, %v1954_v21 }
 0x3ea   : > { %2662 = vmatmul.msk.f32.gmra.mxu0 %vm1302_vm9, %v1961_v16  ;;  %2664 = vmatmul.msk.f32.gmra.mxu1 %vm1302_vm9, %v1961_v16 }
 0x3eb   : > { %2666 = vmatmul.msk.f32.gmra.mxu2 %vm1302_vm9, %v1961_v16  ;;  %2668 = vmatmul.msk.f32.gmra.mxu3 %vm1302_vm9, %v1961_v16 }
 0x446   : > { %v1989_v17 = vpop.f32.mrf.mxu0  ;;  %v2012_v28 = vpop.f32.mrf.mxu1 }
 0x44d   : > { %v2040_v29 = vpop.f32.mrf.mxu2  ;;  %v2063_v36 = vpop.f32.mrf.mxu3 }
 0x457   : > { %v1992_v47 = vpop.f32.mrf.mxu0  ;;  %v2015_v39 = vpop.f32.mrf.mxu1 }
 0x45e   : > { %v2043_v48 = vpop.f32.mrf.mxu2  ;;  %v2066_v42 = vpop.f32.mrf.mxu3 }
 0x45f   : > { %v2091_v6 = vpop.f32.mrf.mxu0  ;;  %v2114_v7 = vpop.f32.mrf.mxu1 }
 0x466   : > { %v2142_v32 = vpop.f32.mrf.mxu2  ;;  %v2165_v33 = vpop.f32.mrf.mxu3 }
 0x467   : > { %v2094_v43 = vpop.f32.mrf.mxu0  ;;  %v2117_v46 = vpop.f32.mrf.mxu1 }
 0x46e   : > { %v2145_v26 = vpop.f32.mrf.mxu2  ;;  %v2168_v27 = vpop.f32.mrf.mxu3 }
 0x46f   : > { %2210 = vmatpush.msrb.mxu0 %v2145_v26  ;;  %2248 = vmatpush.msrb.mxu1 %v2168_v27 }
 0x470   : > { %2329 = vmatpush.msra.mxu2 %v2145_v26  ;;  %2367 = vmatpush.msra.mxu3 %v2168_v27 }
 0x471   : > { %2211 = vmatpush.msrb.mxu0 %v2142_v32  ;;  %2249 = vmatpush.msrb.mxu1 %v2165_v33 }
 0x472   : > { %2330 = vmatpush.msra.mxu2 %v2142_v32  ;;  %2368 = vmatpush.msra.mxu3 %v2165_v33 }
 0x473   : > { %2212 = vmatpush.msrb.mxu0 %v2094_v43  ;;  %2250 = vmatpush.msrb.mxu1 %v2117_v46 }
 0x474   : > { %2331 = vmatpush.msra.mxu2 %v2094_v43  ;;  %2369 = vmatpush.msra.mxu3 %v2117_v46 }
 0x475   : > { %2213 = vmatpush.msrb.mxu0 %v2091_v6  ;;  %2251 = vmatpush.msrb.mxu1 %v2114_v7 }
 0x476   : > { %2332 = vmatpush.msra.mxu2 %v2091_v6  ;;  %2370 = vmatpush.msra.mxu3 %v2114_v7 }
 0x477   : > { %2214 = vmatpush.msrb.mxu0 %v2043_v48  ;;  %2252 = vmatpush.msrb.mxu1 %v2066_v42 }
 0x478   : > { %2333 = vmatpush.msra.mxu2 %v2043_v48  ;;  %2371 = vmatpush.msra.mxu3 %v2066_v42 }
 0x479   : > { %2215 = vmatpush.msrb.mxu0 %v2040_v29  ;;  %2253 = vmatpush.msrb.mxu1 %v2063_v36 }
 0x47a   : > { %2334 = vmatpush.msra.mxu2 %v2040_v29  ;;  %2372 = vmatpush.msra.mxu3 %v2063_v36 }
 0x47b   : > { %2216 = vmatpush.msrb.mxu0 %v1992_v47  ;;  %2254 = vmatpush.msrb.mxu1 %v2015_v39 }
 0x47c   : > { %2335 = vmatpush.msra.mxu2 %v1992_v47  ;;  %2373 = vmatpush.msra.mxu3 %v2015_v39 }
 0x47d   : > { %2217 = vmatpush.msrb.mxu0 %v1989_v17  ;;  %2255 = vmatpush.msrb.mxu1 %v2012_v28 }
 0x47e   : > { %2336 = vmatpush.msra.mxu2 %v1989_v17  ;;  %2374 = vmatpush.msra.mxu3 %v2012_v28 }
 0x47f   : > { %2684 = vmatmul.msk.f32.vlgmr.msra.gmra.mxu2 %vm2180_vm2, %v2293_v49  ;;  %2691 = vmatmul.msk.f32.vlgmr.msra.gmra.mxu3 %vm2180_vm2, %v2293_v49 }
 0x480   : > { %2670 = vmatmul.msk.f32.vlgmr.msrb.gmra.mxu0 %vm2180_vm2, %v2172_v50  ;;  %2677 = vmatmul.msk.f32.vlgmr.msrb.gmra.mxu1 %vm2180_vm2, %v2172_v50 }
 0x487   : > { %2685 = vmatmul.msk.f32.gmra.mxu2 %vm2180_vm2, %v2294_v13  ;;  %2692 = vmatmul.msk.f32.gmra.mxu3 %vm2180_vm2, %v2294_v13 }
 0x488   : > { %2671 = vmatmul.msk.f32.gmra.mxu0 %vm2180_vm2, %v2173_v51  ;;  %2678 = vmatmul.msk.f32.gmra.mxu1 %vm2180_vm2, %v2173_v51 }
 0x48f   : > { %2686 = vmatmul.msk.f32.gmra.mxu2 %vm2180_vm2, %v2295_v4  ;;  %2693 = vmatmul.msk.f32.gmra.mxu3 %vm2180_vm2, %v2295_v4 }
 0x490   : > { %2672 = vmatmul.msk.f32.gmra.mxu0 %vm2180_vm2, %v2174_v45  ;;  %2679 = vmatmul.msk.f32.gmra.mxu1 %vm2180_vm2, %v2174_v45 }
 0x497   : > { %2687 = vmatmul.msk.f32.gmra.mxu2 %vm2180_vm2, %v2296_v52  ;;  %2694 = vmatmul.msk.f32.gmra.mxu3 %vm2180_vm2, %v2296_v52 }
 0x498   : > { %2673 = vmatmul.msk.f32.gmra.mxu0 %vm2180_vm2, %v2175_v8  ;;  %2680 = vmatmul.msk.f32.gmra.mxu1 %vm2180_vm2, %v2175_v8 }
 0x49f   : > { %2688 = vmatmul.msk.f32.gmra.mxu2 %vm2180_vm2, %v2297_v9  ;;  %2695 = vmatmul.msk.f32.gmra.mxu3 %vm2180_vm2, %v2297_v9 }
 0x4a0   : > { %2674 = vmatmul.msk.f32.gmra.mxu0 %vm2180_vm2, %v2176_v53  ;;  %2681 = vmatmul.msk.f32.gmra.mxu1 %vm2180_vm2, %v2176_v53 }
 0x4a7   : > { %2689 = vmatmul.msk.f32.gmra.mxu2 %vm2180_vm2, %v2298_v54  ;;  %2696 = vmatmul.msk.f32.gmra.mxu3 %vm2180_vm2, %v2298_v54 }
 0x4a8   : > { %2675 = vmatmul.msk.f32.gmra.mxu0 %vm2180_vm2, %v2177_v57  ;;  %2682 = vmatmul.msk.f32.gmra.mxu1 %vm2180_vm2, %v2177_v57 }
 0x4af   : > { %2690 = vmatmul.msk.f32.gmra.mxu2 %vm2180_vm2, %v2299_v0  ;;  %2697 = vmatmul.msk.f32.gmra.mxu3 %vm2180_vm2, %v2299_v0 }
 0x4b0   : > { %2676 = vmatmul.msk.f32.gmra.mxu0 %vm2180_vm2, %v2178_v58  ;;  %2683 = vmatmul.msk.f32.gmra.mxu1 %vm2180_vm2, %v2178_v58 }
 0x4fd   : > { %v2219_v59 = vpop.f32.mrf.mxu0  ;;  %v2257_v60 = vpop.f32.mrf.mxu1 }
 0x4fe   : > { %v2220_v41 = vadd.f32 %v2219_v59, %v4107_v38  ;;  %v2258_v63 = vadd.f32 %v2257_v60, %v4107_v38 }
 0x500   : > { %2278 = vst [vmem:[%s4111_s21] sm:$0xff] %v2220_v41 }
 0x501   : > { %2280 = vst.msk [vmem:[%s4111_s21 + $0x8] sm:$0xff] %vm2279_vm3, %v2258_v63 }
 0x502   : > { %v2338_v37 = vpop.f32.mrf.mxu2  ;;  %v2376_v3 = vpop.f32.mrf.mxu3 }
 0x503   : > { %v2339_v62 = vadd.f32 %v2338_v37, %v4107_v38  ;;  %v2377_v40 = vadd.f32 %v2376_v3, %v4107_v38 }
 0x505   : > { %2397 = vst [vmem:[%s4111_s21 + $0x70] sm:$0xff] %v2339_v62  ;;  %v2222_v61 = vpop.f32.mrf.mxu0  ;;  %v2260_v5 = vpop.f32.mrf.mxu1 }
 0x506   : > { %2398 = vst.msk [vmem:[%s4111_s21 + $0x78] sm:$0xff] %vm2279_vm3, %v2377_v40  ;;  %v2223_v30 = vadd.f32 %v2222_v61, %v4107_v38  ;;  %v2261_v1 = vadd.f32 %v2260_v5, %v4107_v38 }
 0x508   : > { %2281 = vst [vmem:[%s4111_s21 + $0x10] sm:$0xff] %v2223_v30 }
 0x509   : > { %2282 = vst.msk [vmem:[%s4111_s21 + $0x18] sm:$0xff] %vm2279_vm3, %v2261_v1 }
 0x50a   : > { %v2341_v10 = vpop.f32.mrf.mxu2  ;;  %v2379_v2 = vpop.f32.mrf.mxu3 }
 0x50b   : > { %v2342_v44 = vadd.f32 %v2341_v10, %v4107_v38  ;;  %v2380_v12 = vadd.f32 %v2379_v2, %v4107_v38 }
 0x50d   : > { %2399 = vst [vmem:[%s4111_s21 + $0x80] sm:$0xff] %v2342_v44  ;;  %v2225_v14 = vpop.f32.mrf.mxu0  ;;  %v2263_v15 = vpop.f32.mrf.mxu1 }
 0x50e   : > { %2400 = vst.msk [vmem:[%s4111_s21 + $0x88] sm:$0xff] %vm2279_vm3, %v2380_v12  ;;  %v2226_v20 = vadd.f32 %v2225_v14, %v4107_v38  ;;  %v2264_v21 = vadd.f32 %v2263_v15, %v4107_v38 }
 0x510   : > { %2283 = vst [vmem:[%s4111_s21 + $0x20] sm:$0xff] %v2226_v20 }
 0x511   : > { %2284 = vst.msk [vmem:[%s4111_s21 + $0x28] sm:$0xff] %vm2279_vm3, %v2264_v21 }
 0x512   : > { %v2344_v22 = vpop.f32.mrf.mxu2  ;;  %v2382_v23 = vpop.f32.mrf.mxu3 }
 0x513   : > { %v2345_v55 = vadd.f32 %v2344_v22, %v4107_v38  ;;  %v2383_v24 = vadd.f32 %v2382_v23, %v4107_v38 }
 0x515   : > { %2401 = vst [vmem:[%s4111_s21 + $0x90] sm:$0xff] %v2345_v55  ;;  %v2228_v56 = vpop.f32.mrf.mxu0  ;;  %v2266_v25 = vpop.f32.mrf.mxu1 }
 0x516   : > { %2402 = vst.msk [vmem:[%s4111_s21 + $0x98] sm:$0xff] %vm2279_vm3, %v2383_v24  ;;  %v2229_v19 = vadd.f32 %v2228_v56, %v4107_v38  ;;  %v2267_v34 = vadd.f32 %v2266_v25, %v4107_v38 }
 0x518   : > { %2285 = vst [vmem:[%s4111_s21 + $0x30] sm:$0xff] %v2229_v19 }
 0x519   : > { %2286 = vst.msk [vmem:[%s4111_s21 + $0x38] sm:$0xff] %vm2279_vm3, %v2267_v34 }
 0x51a   : > { %v2347_v35 = vpop.f32.mrf.mxu2  ;;  %v2385_v18 = vpop.f32.mrf.mxu3 }
 0x51b   : > { %v2348_v31 = vadd.f32 %v2347_v35, %v4107_v38  ;;  %v2386_v11 = vadd.f32 %v2385_v18, %v4107_v38 }
 0x51d   : > { %2403 = vst [vmem:[%s4111_s21 + $0xa0] sm:$0xff] %v2348_v31  ;;  %v2231_v16 = vpop.f32.mrf.mxu0  ;;  %v2269_v17 = vpop.f32.mrf.mxu1 }
 0x51e   : > { %2404 = vst.msk [vmem:[%s4111_s21 + $0xa8] sm:$0xff] %vm2279_vm3, %v2386_v11  ;;  %v2232_v28 = vadd.f32 %v2231_v16, %v4107_v38  ;;  %v2270_v29 = vadd.f32 %v2269_v17, %v4107_v38 }
 0x520   : > { %2287 = vst [vmem:[%s4111_s21 + $0x40] sm:$0xff] %v2232_v28 }
 0x521   : > { %2288 = vst.msk [vmem:[%s4111_s21 + $0x48] sm:$0xff] %vm2279_vm3, %v2270_v29 }
 0x522   : > { %v2350_v36 = vpop.f32.mrf.mxu2  ;;  %v2388_v47 = vpop.f32.mrf.mxu3 }
 0x523   : > { %v2351_v39 = vadd.f32 %v2350_v36, %v4107_v38  ;;  %v2389_v48 = vadd.f32 %v2388_v47, %v4107_v38 }
 0x525   : > { %2405 = vst [vmem:[%s4111_s21 + $0xb0] sm:$0xff] %v2351_v39  ;;  %v2234_v42 = vpop.f32.mrf.mxu0  ;;  %v2272_v32 = vpop.f32.mrf.mxu1 }
 0x526   : > { %2406 = vst.msk [vmem:[%s4111_s21 + $0xb8] sm:$0xff] %vm2279_vm3, %v2389_v48  ;;  %v2235_v33 = vadd.f32 %v2234_v42, %v4107_v38  ;;  %v2273_v6 = vadd.f32 %v2272_v32, %v4107_v38 }
 0x528   : > { %2289 = vst [vmem:[%s4111_s21 + $0x50] sm:$0xff] %v2235_v33 }
 0x529   : > { %2290 = vst.msk [vmem:[%s4111_s21 + $0x58] sm:$0xff] %vm2279_vm3, %v2273_v6 }
 0x52a   : > { %v2353_v7 = vpop.f32.mrf.mxu2  ;;  %v2391_v26 = vpop.f32.mrf.mxu3 }
 0x52b   : > { %v2354_v27 = vadd.f32 %v2353_v7, %v4107_v38  ;;  %v2392_v43 = vadd.f32 %v2391_v26, %v4107_v38 }
 0x52d   : > { %2407 = vst [vmem:[%s4111_s21 + $0xc0] sm:$0xff] %v2354_v27  ;;  %v2237_v46 = vpop.f32.mrf.mxu0  ;;  %v2275_v49 = vpop.f32.mrf.mxu1 }
 0x52e   : > { %2408 = vst.msk [vmem:[%s4111_s21 + $0xc8] sm:$0xff] %vm2279_vm3, %v2392_v43  ;;  %v2238_v50 = vadd.f32 %v2237_v46, %v4107_v38  ;;  %v2276_v13 = vadd.f32 %v2275_v49, %v4107_v38 }
 0x530   : > { %2291 = vst [vmem:[%s4111_s21 + $0x60] sm:$0xff] %v2238_v50 }
 0x531   : > { %2292 = vst.msk [vmem:[%s4111_s21 + $0x68] sm:$0xff] %vm2279_vm3, %v2276_v13 }
 0x532   : > { %v2356_v51 = vpop.f32.mrf.mxu2  ;;  %v2394_v4 = vpop.f32.mrf.mxu3 }
 0x533   : > { %v2357_v45 = vadd.f32 %v2356_v51, %v4107_v38  ;;  %v2395_v52 = vadd.f32 %v2394_v4, %v4107_v38 }
 0x535   : > { %2409 = vst [vmem:[%s4111_s21 + $0xd0] sm:$0xff] %v2357_v45 }
 0x536   : > { %2410 = vst.msk [vmem:[%s4111_s21 + $0xd8] sm:$0xff] %vm2279_vm3, %v2395_v52 }
 0x537   : > { %3169 = shalt.err (!%p3166_p11)
}
 0x538   : > { %s3269_s12 = smov 256  }
 0x539   : > { %2718 = dma.vmem_to_hbm [thread:$0]  (%p3377_p3), %s2428_s15, 3584, %s2430_s30, %s2412_s18, %s3269_s12, %s3269_s12, %s3256_s28  }
 0x53a PF: > { %s4261_s21 = sld [smem:[#allocation14_spill]]  ;;  %p2740_p12 = scmp.ge.s32.totalorder %s3248_s20, 2 }
 0x53c   : > { %p2731_p13 = pnand %p2740_p12, %p3386_p8 }
 0x53e   : > { %p2732_p0 = pneg %p2731_p13 }
 0x540   : > { %s2444_s16 = sand.u32 1, %s4261_s21  }
 0x541   : > { %s2445_s17 = scalar_lea.sflag [#allocation4], %s2444_s16 }
 0x542   : > { %3215 = dma.done.wait (%p2732_p0), %s2445_s17, 3584  }
 0x543   : > { %3217 = vsyncadd (%p2732_p0), %s2445_s17, 4294963712  ;;  %s26_s20 = sadd.s32 1, %s3248_s20   ;;  %s4263_s5 = sld [smem:[#allocation15_spill]] }
 0x544   : > { %p23_p1 = scmp.ge.s32.totalorder %s26_s20, 6   ;;  %s4264_s15 = sld [smem:[#allocation21_spill]] }
 0x545   : > { %s4265_s16 = sld [smem:[#allocation16_spill]]  ;;  %s4269_s13 = smov %s3224_s14 }
 0x546   : > { %s4266_s17 = sld [smem:[#allocation17_spill]]  ;;  %25 = sbr.rel (!%p23_p1) target bundleno = 10 (0xa), region = 138 }
 0x547   : > { %s4267_s18 = sld [smem:[#allocation18_spill]] }
 0x548   : > { %s4268_s19 = sld [smem:[#allocation19_spill]] }
 0x549   : > { %s4270_s14 = smov %s4263_s5 }
 0x54b   :  { %2451 = vsyncpa [#allocation3], 1 }
 0x54c   :  { %2453 = vsyncpa [#allocation3 + $0x1], 1 }
 0x54d   :  { %2454 = vsyncpa [#allocation7], 1 }
 0x54e   :  { %2455 = vsyncpa [#allocation4], 1 }
 0x54f   :  { %2457 = vsyncpa [#allocation4 + $0x1], 1 }
 0x550   :  { %2458 = vsyncpa [#allocation5], 1 }
 0x551   :  { %2460 = vsyncpa [#allocation5 + $0x1], 1 }

</bundles_post_ra>
